<compile_context>
chip_gen: v5e
topology: v5e:2x2
jax: 0.10.0
libtpu: 0.0.40
codegen_flags: <defaults>
</compile_context>

<pallas_src>
import functools

import jax
import jax.numpy as jnp
from jax import lax
from jax.experimental import pallas as pl
from jax.experimental.pallas import tpu as pltpu

EPS = 1e-5
LANE = 128
VMEM_LIMIT = 32 * 1024 * 1024


def _round_up(x, m):
    return (x + m - 1) // m * m


# ---------------------------------------------------------------------------
# in-kernel helpers
# ---------------------------------------------------------------------------
def _accumulate_stats(acc_ref, y):
    """Accumulate per-channel sum (row 0) and sum-of-squares (row 1)."""
    acc_ref[0:1, :] += jnp.sum(y, axis=0, keepdims=True)
    acc_ref[1:2, :] += jnp.sum(y * y, axis=0, keepdims=True)


def _finalize_affine(ab_ref, acc_ref, g_ref, b_ref, m_real):
    """Turn (sum, sumsq) into the BN affine: row 0 = scale, row 1 = shift."""
    inv_m = 1.0 / m_real
    mean = acc_ref[0:1, :] * inv_m
    var = jnp.maximum(acc_ref[1:2, :] * inv_m - mean * mean, 0.0)
    scale = g_ref[...] * lax.rsqrt(var + EPS)          # EUP
    ab_ref[0:1, :] = scale
    ab_ref[1:2, :] = b_ref[...] - mean * scale


# ---------------------------------------------------------------------------
# Pallas kernels
# ---------------------------------------------------------------------------
def conv_stats_kernel(x_ref, w_ref, g_ref, b_ref, y_ref, ab_ref, acc_ref, *, m_real):
    # x: (TM, K) bf16, w: (K, C) bf16, g/b: (1, C) f32
    # y: (TM, C) f32 per-tile output; ab: (2, C) f32 [scale; shift] accumulator output
    i = pl.program_id(0)

    @pl.when(i == 0)
    def _init():
        acc_ref[...] = jnp.zeros_like(acc_ref)

    y = jnp.dot(x_ref[...], w_ref[...], preferred_element_type=jnp.float32)
    y_ref[...] = y
    _accumulate_stats(acc_ref, y)

    @pl.when(i == pl.num_programs(0) - 1)
    def _fin():
        _finalize_affine(ab_ref, acc_ref, g_ref, b_ref, m_real)


def affine_relu_kernel(y_ref, ab_ref, o_ref):
    z = y_ref[...] * ab_ref[0:1, :] + ab_ref[1:2, :]
    o_ref[...] = jnp.maximum(z, 0.0).astype(o_ref.dtype)


def dual_conv_stats_kernel(y2_ref, ab2_ref, xs_ref,
                           w3_ref, g3_ref, b3_ref,
                           w4_ref, g4_ref, b4_ref,
                           y3_ref, y4_ref, ab3_ref, ab4_ref,
                           acc3_ref, acc4_ref, *, m_real, tile_m, mask_rows):
    i = pl.program_id(0)

    @pl.when(i == 0)
    def _init():
        acc3_ref[...] = jnp.zeros_like(acc3_ref)
        acc4_ref[...] = jnp.zeros_like(acc4_ref)

    # prologue: apply BN2 affine + ReLU to the raw conv2 output tile.
    a2 = jnp.maximum(y2_ref[...] * ab2_ref[0:1, :] + ab2_ref[1:2, :], 0.0)
    if mask_rows:
        # zero the padded rows so they do not pollute conv3's batch statistics.
        rows = i * tile_m + lax.broadcasted_iota(jnp.int32, (tile_m, 1), 0)
        a2 = jnp.where(rows < m_real, a2, 0.0)

    y3 = jnp.dot(a2.astype(w3_ref.dtype), w3_ref[...],
                 preferred_element_type=jnp.float32)
    y4 = jnp.dot(xs_ref[...], w4_ref[...], preferred_element_type=jnp.float32)
    y3_ref[...] = y3
    y4_ref[...] = y4
    _accumulate_stats(acc3_ref, y3)
    _accumulate_stats(acc4_ref, y4)

    @pl.when(i == pl.num_programs(0) - 1)
    def _fin():
        _finalize_affine(ab3_ref, acc3_ref, g3_ref, b3_ref, m_real)
        _finalize_affine(ab4_ref, acc4_ref, g4_ref, b4_ref, m_real)


def merge_relu_kernel(y3_ref, ab3_ref, y4_ref, ab4_ref, o_ref):
    z = (y3_ref[...] * ab3_ref[0:1, :] + ab3_ref[1:2, :]
         + y4_ref[...] * ab4_ref[0:1, :] + ab4_ref[1:2, :])
    o_ref[...] = jnp.maximum(z, 0.0)


# ---------------------------------------------------------------------------
# pallas_call wrappers
# ---------------------------------------------------------------------------
def _row_spec(tile_m, c):
    return pl.BlockSpec((tile_m, c), lambda i: (i, 0))


def _full_spec(shape):
    nd = len(shape)
    return pl.BlockSpec(shape, lambda i, _nd=nd: (0,) * _nd)


def conv_bn_stats(x2d, w, gamma, beta, m_real, tile_m):
    """y = x2d @ w (bf16 ops, f32 acc) plus BN batch-stat -> (scale, shift)."""
    mp, kdim = x2d.shape
    c = w.shape[1]
    flops = 2 * mp * kdim * c
    bytes_accessed = x2d.size * 2 + w.size * 2 + mp * c * 4 + 4 * c * 4
    return pl.pallas_call(
        functools.partial(conv_stats_kernel, m_real=m_real),
        grid=(mp // tile_m,),
        in_specs=[_row_spec(tile_m, kdim), _full_spec((kdim, c)),
                  _full_spec((1, c)), _full_spec((1, c))],
        out_specs=[_row_spec(tile_m, c), _full_spec((2, c))],
        out_shape=(jax.ShapeDtypeStruct((mp, c), jnp.float32),
                   jax.ShapeDtypeStruct((2, c), jnp.float32)),
        scratch_shapes=[pltpu.VMEM((2, c), jnp.float32)],
        compiler_params=pltpu.CompilerParams(
            dimension_semantics=("arbitrary",),   # stats accumulator revisits its block
            vmem_limit_bytes=VMEM_LIMIT),
        cost_estimate=pl.CostEstimate(flops=int(flops), transcendentals=int(c),
                                      bytes_accessed=int(bytes_accessed)),
    )(x2d, w, gamma, beta)


def bn_apply_relu(y, ab, tile_m, out_dtype):
    mp, c = y.shape
    return pl.pallas_call(
        affine_relu_kernel,
        grid=(mp // tile_m,),
        in_specs=[_row_spec(tile_m, c), _full_spec((2, c))],
        out_specs=_row_spec(tile_m, c),
        out_shape=jax.ShapeDtypeStruct((mp, c), out_dtype),
        compiler_params=pltpu.CompilerParams(
            dimension_semantics=("parallel",),
            vmem_limit_bytes=VMEM_LIMIT),
    )(y, ab)


def dual_conv_bn_stats(y2_raw, ab2, xs2d, w3, g3, b3, w4, g4, b4, m_real, tile_m):
    mp, c2 = y2_raw.shape
    k4 = xs2d.shape[1]
    c3 = w3.shape[1]
    flops = 2 * mp * c3 * (c2 + k4)
    bytes_accessed = (y2_raw.size * 4 + xs2d.size * 2
                      + (w3.size + w4.size) * 2 + 2 * mp * c3 * 4)
    kern = functools.partial(dual_conv_stats_kernel, m_real=m_real,
                             tile_m=tile_m, mask_rows=(mp != m_real))
    return pl.pallas_call(
        kern,
        grid=(mp // tile_m,),
        in_specs=[_row_spec(tile_m, c2), _full_spec((2, c2)),
                  _row_spec(tile_m, k4),
                  _full_spec((c2, c3)), _full_spec((1, c3)), _full_spec((1, c3)),
                  _full_spec((k4, c3)), _full_spec((1, c3)), _full_spec((1, c3))],
        out_specs=[_row_spec(tile_m, c3), _row_spec(tile_m, c3),
                   _full_spec((2, c3)), _full_spec((2, c3))],
        out_shape=(jax.ShapeDtypeStruct((mp, c3), jnp.float32),
                   jax.ShapeDtypeStruct((mp, c3), jnp.float32),
                   jax.ShapeDtypeStruct((2, c3), jnp.float32),
                   jax.ShapeDtypeStruct((2, c3), jnp.float32)),
        scratch_shapes=[pltpu.VMEM((2, c3), jnp.float32),
                        pltpu.VMEM((2, c3), jnp.float32)],
        compiler_params=pltpu.CompilerParams(
            dimension_semantics=("arbitrary",),
            vmem_limit_bytes=VMEM_LIMIT),
        cost_estimate=pl.CostEstimate(flops=int(flops), transcendentals=int(2 * c3),
                                      bytes_accessed=int(bytes_accessed)),
    )(y2_raw, ab2, xs2d, w3, g3, b3, w4, g4, b4)


def merge_bn_add_relu(y3, ab3, y4, ab4, tile_m):
    mp, c = y3.shape
    return pl.pallas_call(
        merge_relu_kernel,
        grid=(mp // tile_m,),
        in_specs=[_row_spec(tile_m, c), _full_spec((2, c)),
                  _row_spec(tile_m, c), _full_spec((2, c))],
        out_specs=_row_spec(tile_m, c),
        out_shape=jax.ShapeDtypeStruct((mp, c), jnp.float32),
        compiler_params=pltpu.CompilerParams(
            dimension_semantics=("parallel",),
            vmem_limit_bytes=VMEM_LIMIT),
    )(y3, ab3, y4, ab4)


# ---------------------------------------------------------------------------
# full ConvBlock forward (glue: transpose / subsample / pad / im2col / reshape)
# ---------------------------------------------------------------------------
def _pad2(a, rows, cols):
    return jnp.pad(a, ((0, rows - a.shape[0]), (0, cols - a.shape[1])))


def _pad_vec(v, c):
    return jnp.pad(v, (0, c - v.shape[0])).reshape(1, c).astype(jnp.float32)


def conv_block_forward(x_nchw, p, kernel_size, stride, tile_m=512):
    """Pallas forward of the torch ConvBlock (train-mode BatchNorm)."""
    assert kernel_size % 2 == 1, "autopad path implemented for odd kernels"
    k = kernel_size

    # NCHW -> NHWC; a 1x1 stride-s pad-0 conv == strided subsample + matmul.
    x = jnp.transpose(x_nchw, (0, 2, 3, 1)).astype(jnp.float32)
    xs = x[:, ::stride, ::stride, :]
    N, Ho, Wo, cin = xs.shape
    M = N * Ho * Wo

    f1, f2, f3 = p['g1'].shape[0], p['g2'].shape[0], p['g3'].shape[0]
    cin_p, f1_p, f2_p, f3_p = (_round_up(c, LANE) for c in (cin, f1, f2, f3))

    # Row tile: multiple of 16 sublanes (bf16 operands); pad M up to whole tiles.
    tm = min(tile_m, _round_up(M, 16))
    tm = max(16, _round_up(tm, 16))
    mp = _round_up(M, tm)

    # ---- parameters: lane-pad channels, bf16 matmul operands, f32 BN params.
    w1 = _pad2(jnp.transpose(p['w1_t'][:, :, 0, 0], (1, 0)), cin_p, f1_p).astype(jnp.bfloat16)
    w3 = _pad2(jnp.transpose(p['w3_t'][:, :, 0, 0], (1, 0)), f2_p, f3_p).astype(jnp.bfloat16)
    w4 = _pad2(jnp.transpose(p['w4_t'][:, :, 0, 0], (1, 0)), cin_p, f3_p).astype(jnp.bfloat16)
    w2 = jnp.transpose(p['w2_t'], (2, 3, 1, 0))                     # (k, k, f1, f2)
    w2 = jnp.pad(w2, ((0, 0), (0, 0), (0, f1_p - f1), (0, f2_p - f2)))
    w2_cols = w2.reshape(k * k * f1_p, f2_p).astype(jnp.bfloat16)

    g1, b1 = _pad_vec(p['g1'], f1_p), _pad_vec(p['b1'], f1_p)
    g2, b2 = _pad_vec(p['g2'], f2_p), _pad_vec(p['b2'], f2_p)
    g3, b3 = _pad_vec(p['g3'], f3_p), _pad_vec(p['b3'], f3_p)
    g4, b4 = _pad_vec(p['g4'], f3_p), _pad_vec(p['b4'], f3_p)

    # ---- shared strided/flattened input for conv1 and conv4 (shortcut).
    xs2d = jnp.pad(xs, ((0, 0), (0, 0), (0, 0), (0, cin_p - cin)))
    xs2d = xs2d.reshape(M, cin_p)
    xs2d = jnp.pad(xs2d, ((0, mp - M), (0, 0))).astype(jnp.bfloat16)

    # conv1 (1x1/s) + BN1 batch stats, then BN1 affine + ReLU.
    y1_raw, ab1 = conv_bn_stats(xs2d, w1, g1, b1, M, tm)
    y1 = bn_apply_relu(y1_raw, ab1, tm, jnp.bfloat16)

    # conv2 (kxk, stride 1, autopad) as one matmul over an im2col slab.
    pad = k // 2
    y1_sp = y1[:M].reshape(N, Ho, Wo, f1_p)
    y1_sp = jnp.pad(y1_sp, ((0, 0), (pad, pad), (pad, pad), (0, 0)))
    cols = [y1_sp[:, ky:ky + Ho, kx:kx + Wo, :]
            for ky in range(k) for kx in range(k)]
    x2_cols = jnp.concatenate(cols, axis=-1).reshape(M, k * k * f1_p)
    x2_cols = jnp.pad(x2_cols, ((0, mp - M), (0, 0)))
    y2_raw, ab2 = conv_bn_stats(x2_cols, w2_cols, g2, b2, M, tm)

    # conv3 (on relu(bn2(y2))) + conv4 (shortcut) + both BN stats in one pass.
    y3_raw, y4_raw, ab3, ab4 = dual_conv_bn_stats(
        y2_raw, ab2, xs2d, w3, g3, b3, w4, g4, b4, M, tm)

    # bn3 + bn4 + add + ReLU.
    out2d = merge_bn_add_relu(y3_raw, ab3, y4_raw, ab4, tm)

    out = out2d[:M, :f3].reshape(N, Ho, Wo, f3)
    return jnp.transpose(out, (0, 3, 1, 2))                        # NHWC -> NCHW


# ---------------------------------------------------------------------------
# pure-JAX reference (NCHW, mirrors torch train-mode semantics)
# ---------------------------------------------------------------------------
def ref_forward(x, p, kernel_size, stride):
    def conv(x, w, s, pad):
        return lax.conv_general_dilated(
            x, w, (s, s), [(pad, pad), (pad, pad)],
            dimension_numbers=('NCHW', 'OIHW', 'NCHW'))

    def bn(y, gamma, beta):
        mean = jnp.mean(y, axis=(0, 2, 3), keepdims=True)
        var = jnp.mean(jnp.square(y - mean), axis=(0, 2, 3), keepdims=True)
        g = gamma.reshape(1, -1, 1, 1)
        b = beta.reshape(1, -1, 1, 1)
        return (y - mean) * g * lax.rsqrt(var + EPS) + b

    y = jax.nn.relu(bn(conv(x, p['w1_t'], stride, 0), p['g1'], p['b1']))
    y = jax.nn.relu(bn(conv(y, p['w2_t'], 1, kernel_size // 2), p['g2'], p['b2']))
    y3 = bn(conv(y, p['w3_t'], 1, 0), p['g3'], p['b3'])
    y4 = bn(conv(x, p['w4_t'], stride, 0), p['g4'], p['b4'])
    return jax.nn.relu(y3 + y4)


# ---------------------------------------------------------------------------
if __name__ == "__main__":
    N, Cin, H, W = 2, 4, 16, 16
    kernel_size = 3
    F1, F2, F3 = 4, 4, 8
    stride = 2

    keys = jax.random.split(jax.random.PRNGKey(0), 13)
    x = jax.random.normal(keys[0], (N, Cin, H, W), jnp.float32)

    params = dict(
        w1_t=0.5 * jax.random.normal(keys[1], (F1, Cin, 1, 1), jnp.float32),
        w2_t=0.2 * jax.random.normal(keys[2], (F2, F1, kernel_size, kernel_size),
                                     jnp.float32),
        w3_t=0.5 * jax.random.normal(keys[3], (F3, F2, 1, 1), jnp.float32),
        w4_t=0.5 * jax.random.normal(keys[4], (F3, Cin, 1, 1), jnp.float32),
        g1=1.0 + 0.1 * jax.random.normal(keys[5], (F1,), jnp.float32),
        b1=0.1 * jax.random.normal(keys[6], (F1,), jnp.float32),
        g2=1.0 + 0.1 * jax.random.normal(keys[7], (F2,), jnp.float32),
        b2=0.1 * jax.random.normal(keys[8], (F2,), jnp.float32),
        g3=1.0 + 0.1 * jax.random.normal(keys[9], (F3,), jnp.float32),
        b3=0.1 * jax.random.normal(keys[10], (F3,), jnp.float32),
        g4=1.0 + 0.1 * jax.random.normal(keys[11], (F3,), jnp.float32),
        b4=0.1 * jax.random.normal(keys[12], (F3,), jnp.float32),
    )

    # tile_m=48 at this toy size (M=128 -> Mp=144, grid of 3) exercises both the
    # cross-tile BN stats accumulation and the padded-row masking path.
    fwd = jax.jit(conv_block_forward, static_argnums=(2, 3, 4))
    out = jax.block_until_ready(fwd(x, params, kernel_size, stride, 48))

    ref = jax.block_until_ready(ref_forward(x, params, kernel_size, stride))
    assert out.shape == (N, F3, (H + 1) // 2, (W + 1) // 2), out.shape
    max_err = float(jnp.max(jnp.abs(out - ref)))
    assert jnp.allclose(out, ref, atol=5e-2, rtol=5e-2), max_err

    print("KERNEL_OK")
</pallas_src>

<mosaic_0001>
module attributes {stable_mosaic.version = 11 : i64} {
  func.func @affine_relu_kernel(%arg0: i32, %arg1: memref<48x128xf32, #tpu.memory_space<vmem>>, %arg2: memref<2x128xf32, #tpu.memory_space<vmem>>, %arg3: memref<48x128xbf16, #tpu.memory_space<vmem>>) attributes {dimension_semantics = [#tpu.dimension_semantics<parallel>], iteration_bounds = array<i64: 3>, scalar_prefetch = 0 : i64, scratch_operands = 0 : i64, tpu.core_type = #tpu.core_type<tc>, window_params = [{transform_indices = @transform_0, window_bounds = array<i64: 48, 128>}, {pipeline_mode = #tpu.pipeline_mode<synchronous>, transform_indices = @transform_1, window_bounds = array<i64: 2, 128>}, {transform_indices = @transform_2, window_bounds = array<i64: 48, 128>}]} {
    %c0 = arith.constant 0 : index
    %c0_0 = arith.constant 0 : index
    %0 = vector.load %arg1[%c0, %c0_0] : memref<48x128xf32, #tpu.memory_space<vmem>>, vector<48x128xf32>
    %c0_1 = arith.constant 0 : index
    %c0_2 = arith.constant 0 : index
    %1 = vector.load %arg2[%c0_1, %c0_2] : memref<2x128xf32, #tpu.memory_space<vmem>>, vector<1x128xf32>
    %2 = vector.broadcast %1 : vector<1x128xf32> to vector<48x128xf32>
    %3 = arith.mulf %0, %2 : vector<48x128xf32>
    %c1 = arith.constant 1 : index
    %c0_3 = arith.constant 0 : index
    %4 = vector.load %arg2[%c1, %c0_3] : memref<2x128xf32, #tpu.memory_space<vmem>>, vector<1x128xf32>
    %5 = vector.broadcast %4 : vector<1x128xf32> to vector<48x128xf32>
    %6 = arith.addf %3, %5 : vector<48x128xf32>
    %cst = arith.constant 0.000000e+00 : f32
    %7 = vector.broadcast %cst : f32 to vector<48x128xf32>
    %8 = arith.maximumf %6, %7 : vector<48x128xf32>
    %9 = arith.truncf %8 : vector<48x128xf32> to vector<48x128xbf16>
    %c0_4 = arith.constant 0 : index
    %c0_5 = arith.constant 0 : index
    %10 = vector.load %arg3[%c0_4, %c0_5] : memref<48x128xbf16, #tpu.memory_space<vmem>>, vector<48x128xbf16>
    tpu.vector_store %arg3[%c0_4, %c0_5], %9 {strides = array<i32>} : memref<48x128xbf16, #tpu.memory_space<vmem>>, vector<48x128xbf16>,
    return
  }
  func.func @transform_0(%arg0: i32) -> (i32, i32) {
    %c0_i32 = arith.constant 0 : i32
    %c0_i32_0 = arith.constant 0 : i32
    return %arg0, %c0_i32 : i32, i32
  }
  func.func @transform_1(%arg0: i32) -> (i32, i32) {
    %c0_i32 = arith.constant 0 : i32
    %c0_i32_0 = arith.constant 0 : i32
    %c0_i32_1 = arith.constant 0 : i32
    return %c0_i32, %c0_i32_0 : i32, i32
  }
  func.func @transform_2(%arg0: i32) -> (i32, i32) {
    %c0_i32 = arith.constant 0 : i32
    %c0_i32_0 = arith.constant 0 : i32
    return %arg0, %c0_i32 : i32, i32
  }
}

module attributes {stable_mosaic.version = 11 : i64} {
  func.func @conv_stats_kernel(%arg0: i32, %arg1: memref<48x128xbf16, #tpu.memory_space<vmem>>, %arg2: memref<128x128xbf16, #tpu.memory_space<vmem>>, %arg3: memref<1x128xf32, #tpu.memory_space<vmem>>, %arg4: memref<1x128xf32, #tpu.memory_space<vmem>>, %arg5: memref<48x128xf32, #tpu.memory_space<vmem>>, %arg6: memref<2x128xf32, #tpu.memory_space<vmem>>, %arg7: memref<2x128xf32, #tpu.memory_space<vmem>>) attributes {dimension_semantics = [#tpu.dimension_semantics<arbitrary>], iteration_bounds = array<i64: 3>, scalar_prefetch = 0 : i64, scratch_operands = 1 : i64, tpu.core_type = #tpu.core_type<tc>, window_params = [{transform_indices = @transform_0, window_bounds = array<i64: 48, 128>}, {pipeline_mode = #tpu.pipeline_mode<synchronous>, transform_indices = @transform_1, window_bounds = array<i64: 128, 128>}, {pipeline_mode = #tpu.pipeline_mode<synchronous>, transform_indices = @transform_2, window_bounds = array<i64: 1, 128>}, {pipeline_mode = #tpu.pipeline_mode<synchronous>, transform_indices = @transform_3, window_bounds = array<i64: 1, 128>}, {transform_indices = @transform_4, window_bounds = array<i64: 48, 128>}, {pipeline_mode = #tpu.pipeline_mode<synchronous>, transform_indices = @transform_5, window_bounds = array<i64: 2, 128>}]} {
    %c0_i32 = arith.constant 0 : i32
    %0 = arith.cmpi eq, %arg0, %c0_i32 : i32
    %1 = arith.extui %0 : i1 to i32
    %c0_i32_0 = arith.constant 0 : i32
    %2 = arith.cmpi ne, %1, %c0_i32_0 : i32
    scf.if %2 {
      %cst_16 = arith.constant 0.000000e+00 : f32
      %21 = vector.broadcast %cst_16 : f32 to vector<2x128xf32>
      %c0_17 = arith.constant 0 : index
      %c0_18 = arith.constant 0 : index
      %22 = vector.load %arg7[%c0_17, %c0_18] : memref<2x128xf32, #tpu.memory_space<vmem>>, vector<2x128xf32>
      tpu.vector_store %arg7[%c0_17, %c0_18], %21 {strides = array<i32>} : memref<2x128xf32, #tpu.memory_space<vmem>>, vector<2x128xf32>,
    } else {
    }
    %c0 = arith.constant 0 : index
    %c0_1 = arith.constant 0 : index
    %3 = vector.load %arg1[%c0, %c0_1] : memref<48x128xbf16, #tpu.memory_space<vmem>>, vector<48x128xbf16>
    %c0_2 = arith.constant 0 : index
    %c0_3 = arith.constant 0 : index
    %4 = vector.load %arg2[%c0_2, %c0_3] : memref<128x128xbf16, #tpu.memory_space<vmem>>, vector<128x128xbf16>
    %cst = arith.constant dense<0.000000e+00> : vector<48x128xf32>
    %5 = tpu.matmul %3, %4, %cst {dimension_numbers = #tpu.dot_dimension_numbers<[1], [0], [0], [1], [0, 0, 1, 1], [], []>} : vector<48x128xbf16>, vector<128x128xbf16>, vector<48x128xf32> -> vector<48x128xf32>
    %c0_4 = arith.constant 0 : index
    %c0_5 = arith.constant 0 : index
    %6 = vector.load %arg5[%c0_4, %c0_5] : memref<48x128xf32, #tpu.memory_space<vmem>>, vector<48x128xf32>
    tpu.vector_store %arg5[%c0_4, %c0_5], %5 {strides = array<i32>} : memref<48x128xf32, #tpu.memory_space<vmem>>, vector<48x128xf32>,
    %c0_6 = arith.constant 0 : index
    %c0_7 = arith.constant 0 : index
    %7 = vector.load %arg7[%c0_6, %c0_7] : memref<2x128xf32, #tpu.memory_space<vmem>>, vector<1x128xf32>
    %cst_8 = arith.constant dense<0.000000e+00> : vector<128xf32>
    %8 = vector.multi_reduction <add>, %5, %cst_8 [0] : vector<48x128xf32> to vector<128xf32>
    %9 = vector.shape_cast %8 : vector<128xf32> to vector<1x128xf32>
    %10 = arith.addf %7, %9 : vector<1x128xf32>
    %c0_9 = arith.constant 0 : index
    %c0_10 = arith.constant 0 : index
    %11 = vector.load %arg7[%c0_9, %c0_10] : memref<2x128xf32, #tpu.memory_space<vmem>>, vector<1x128xf32>
    tpu.vector_store %arg7[%c0_9, %c0_10], %10 {strides = array<i32>} : memref<2x128xf32, #tpu.memory_space<vmem>>, vector<1x128xf32>,
    %c1 = arith.constant 1 : index
    %c0_11 = arith.constant 0 : index
    %12 = vector.load %arg7[%c1, %c0_11] : memref<2x128xf32, #tpu.memory_space<vmem>>, vector<1x128xf32>
    %13 = arith.mulf %5, %5 : vector<48x128xf32>
    %cst_12 = arith.constant dense<0.000000e+00> : vector<128xf32>
    %14 = vector.multi_reduction <add>, %13, %cst_12 [0] : vector<48x128xf32> to vector<128xf32>
    %15 = vector.shape_cast %14 : vector<128xf32> to vector<1x128xf32>
    %16 = arith.addf %12, %15 : vector<1x128xf32>
    %c1_13 = arith.constant 1 : index
    %c0_14 = arith.constant 0 : index
    %17 = vector.load %arg7[%c1_13, %c0_14] : memref<2x128xf32, #tpu.memory_space<vmem>>, vector<1x128xf32>
    tpu.vector_store %arg7[%c1_13, %c0_14], %16 {strides = array<i32>} : memref<2x128xf32, #tpu.memory_space<vmem>>, vector<1x128xf32>,
    %c2_i32 = arith.constant 2 : i32
    %18 = arith.cmpi eq, %arg0, %c2_i32 : i32
    %19 = arith.extui %18 : i1 to i32
    %c0_i32_15 = arith.constant 0 : i32
    %20 = arith.cmpi ne, %19, %c0_i32_15 : i32
    scf.if %20 {
      %c0_16 = arith.constant 0 : index
      %c0_17 = arith.constant 0 : index
      %21 = vector.load %arg7[%c0_16, %c0_17] : memref<2x128xf32, #tpu.memory_space<vmem>>, vector<1x128xf32>
      %cst_18 = arith.constant 7.812500e-03 : f32
      %22 = vector.broadcast %cst_18 : f32 to vector<1x128xf32>
      %23 = arith.mulf %21, %22 : vector<1x128xf32>
      %c1_19 = arith.constant 1 : index
      %c0_20 = arith.constant 0 : index
      %24 = vector.load %arg7[%c1_19, %c0_20] : memref<2x128xf32, #tpu.memory_space<vmem>>, vector<1x128xf32>
      %cst_21 = arith.constant 7.812500e-03 : f32
      %25 = vector.broadcast %cst_21 : f32 to vector<1x128xf32>
      %26 = arith.mulf %24, %25 : vector<1x128xf32>
      %27 = arith.mulf %23, %23 : vector<1x128xf32>
      %28 = arith.subf %26, %27 : vector<1x128xf32>
      %cst_22 = arith.constant 0.000000e+00 : f32
      %29 = vector.broadcast %cst_22 : f32 to vector<1x128xf32>
      %30 = arith.maximumf %28, %29 : vector<1x128xf32>
      %c0_23 = arith.constant 0 : index
      %c0_24 = arith.constant 0 : index
      %31 = vector.load %arg3[%c0_23, %c0_24] : memref<1x128xf32, #tpu.memory_space<vmem>>, vector<1x128xf32>
      %cst_25 = arith.constant 9.99999974E-6 : f32
      %32 = vector.broadcast %cst_25 : f32 to vector<1x128xf32>
      %33 = arith.addf %30, %32 : vector<1x128xf32>
      %34 = math.rsqrt %33 : vector<1x128xf32>
      %35 = arith.mulf %31, %34 : vector<1x128xf32>
      %c0_26 = arith.constant 0 : index
      %c0_27 = arith.constant 0 : index
      %36 = vector.load %arg6[%c0_26, %c0_27] : memref<2x128xf32, #tpu.memory_space<vmem>>, vector<1x128xf32>
      tpu.vector_store %arg6[%c0_26, %c0_27], %35 {strides = array<i32>} : memref<2x128xf32, #tpu.memory_space<vmem>>, vector<1x128xf32>,
      %c0_28 = arith.constant 0 : index
      %c0_29 = arith.constant 0 : index
      %37 = vector.load %arg4[%c0_28, %c0_29] : memref<1x128xf32, #tpu.memory_space<vmem>>, vector<1x128xf32>
      %38 = arith.mulf %23, %35 : vector<1x128xf32>
      %39 = arith.subf %37, %38 : vector<1x128xf32>
      %c1_30 = arith.constant 1 : index
      %c0_31 = arith.constant 0 : index
      %40 = vector.load %arg6[%c1_30, %c0_31] : memref<2x128xf32, #tpu.memory_space<vmem>>, vector<1x128xf32>
      tpu.vector_store %arg6[%c1_30, %c0_31], %39 {strides = array<i32>} : memref<2x128xf32, #tpu.memory_space<vmem>>, vector<1x128xf32>,
    } else {
    }
    return
  }
  func.func @transform_0(%arg0: i32) -> (i32, i32) {
    %c0_i32 = arith.constant 0 : i32
    %c0_i32_0 = arith.constant 0 : i32
    return %arg0, %c0_i32 : i32, i32
  }
  func.func @transform_1(%arg0: i32) -> (i32, i32) {
    %c0_i32 = arith.constant 0 : i32
    %c0_i32_0 = arith.constant 0 : i32
    %c0_i32_1 = arith.constant 0 : i32
    return %c0_i32, %c0_i32_0 : i32, i32
  }
  func.func @transform_2(%arg0: i32) -> (i32, i32) {
    %c0_i32 = arith.constant 0 : i32
    %c0_i32_0 = arith.constant 0 : i32
    %c0_i32_1 = arith.constant 0 : i32
    return %c0_i32, %c0_i32_0 : i32, i32
  }
  func.func @transform_3(%arg0: i32) -> (i32, i32) {
    %c0_i32 = arith.constant 0 : i32
    %c0_i32_0 = arith.constant 0 : i32
    %c0_i32_1 = arith.constant 0 : i32
    return %c0_i32, %c0_i32_0 : i32, i32
  }
  func.func @transform_4(%arg0: i32) -> (i32, i32) {
    %c0_i32 = arith.constant 0 : i32
    %c0_i32_0 = arith.constant 0 : i32
    return %arg0, %c0_i32 : i32, i32
  }
  func.func @transform_5(%arg0: i32) -> (i32, i32) {
    %c0_i32 = arith.constant 0 : i32
    %c0_i32_0 = arith.constant 0 : i32
    %c0_i32_1 = arith.constant 0 : i32
    return %c0_i32, %c0_i32_0 : i32, i32
  }
}

module attributes {stable_mosaic.version = 11 : i64} {
  func.func @conv_stats_kernel(%arg0: i32, %arg1: memref<48x1152xbf16, #tpu.memory_space<vmem>>, %arg2: memref<1152x128xbf16, #tpu.memory_space<vmem>>, %arg3: memref<1x128xf32, #tpu.memory_space<vmem>>, %arg4: memref<1x128xf32, #tpu.memory_space<vmem>>, %arg5: memref<48x128xf32, #tpu.memory_space<vmem>>, %arg6: memref<2x128xf32, #tpu.memory_space<vmem>>, %arg7: memref<2x128xf32, #tpu.memory_space<vmem>>) attributes {dimension_semantics = [#tpu.dimension_semantics<arbitrary>], iteration_bounds = array<i64: 3>, scalar_prefetch = 0 : i64, scratch_operands = 1 : i64, tpu.core_type = #tpu.core_type<tc>, window_params = [{transform_indices = @transform_0, window_bounds = array<i64: 48, 1152>}, {pipeline_mode = #tpu.pipeline_mode<synchronous>, transform_indices = @transform_1, window_bounds = array<i64: 1152, 128>}, {pipeline_mode = #tpu.pipeline_mode<synchronous>, transform_indices = @transform_2, window_bounds = array<i64: 1, 128>}, {pipeline_mode = #tpu.pipeline_mode<synchronous>, transform_indices = @transform_3, window_bounds = array<i64: 1, 128>}, {transform_indices = @transform_4, window_bounds = array<i64: 48, 128>}, {pipeline_mode = #tpu.pipeline_mode<synchronous>, transform_indices = @transform_5, window_bounds = array<i64: 2, 128>}]} {
    %c0_i32 = arith.constant 0 : i32
    %0 = arith.cmpi eq, %arg0, %c0_i32 : i32
    %1 = arith.extui %0 : i1 to i32
    %c0_i32_0 = arith.constant 0 : i32
    %2 = arith.cmpi ne, %1, %c0_i32_0 : i32
    scf.if %2 {
      %cst_16 = arith.constant 0.000000e+00 : f32
      %21 = vector.broadcast %cst_16 : f32 to vector<2x128xf32>
      %c0_17 = arith.constant 0 : index
      %c0_18 = arith.constant 0 : index
      %22 = vector.load %arg7[%c0_17, %c0_18] : memref<2x128xf32, #tpu.memory_space<vmem>>, vector<2x128xf32>
      tpu.vector_store %arg7[%c0_17, %c0_18], %21 {strides = array<i32>} : memref<2x128xf32, #tpu.memory_space<vmem>>, vector<2x128xf32>,
    } else {
    }
    %c0 = arith.constant 0 : index
    %c0_1 = arith.constant 0 : index
    %3 = vector.load %arg1[%c0, %c0_1] : memref<48x1152xbf16, #tpu.memory_space<vmem>>, vector<48x1152xbf16>
    %c0_2 = arith.constant 0 : index
    %c0_3 = arith.constant 0 : index
    %4 = vector.load %arg2[%c0_2, %c0_3] : memref<1152x128xbf16, #tpu.memory_space<vmem>>, vector<1152x128xbf16>
    %cst = arith.constant dense<0.000000e+00> : vector<48x128xf32>
    %5 = tpu.matmul %3, %4, %cst {dimension_numbers = #tpu.dot_dimension_numbers<[1], [0], [0], [1], [0, 0, 1, 1], [], []>} : vector<48x1152xbf16>, vector<1152x128xbf16>, vector<48x128xf32> -> vector<48x128xf32>
    %c0_4 = arith.constant 0 : index
    %c0_5 = arith.constant 0 : index
    %6 = vector.load %arg5[%c0_4, %c0_5] : memref<48x128xf32, #tpu.memory_space<vmem>>, vector<48x128xf32>
    tpu.vector_store %arg5[%c0_4, %c0_5], %5 {strides = array<i32>} : memref<48x128xf32, #tpu.memory_space<vmem>>, vector<48x128xf32>,
    %c0_6 = arith.constant 0 : index
    %c0_7 = arith.constant 0 : index
    %7 = vector.load %arg7[%c0_6, %c0_7] : memref<2x128xf32, #tpu.memory_space<vmem>>, vector<1x128xf32>
    %cst_8 = arith.constant dense<0.000000e+00> : vector<128xf32>
    %8 = vector.multi_reduction <add>, %5, %cst_8 [0] : vector<48x128xf32> to vector<128xf32>
    %9 = vector.shape_cast %8 : vector<128xf32> to vector<1x128xf32>
    %10 = arith.addf %7, %9 : vector<1x128xf32>
    %c0_9 = arith.constant 0 : index
    %c0_10 = arith.constant 0 : index
    %11 = vector.load %arg7[%c0_9, %c0_10] : memref<2x128xf32, #tpu.memory_space<vmem>>, vector<1x128xf32>
    tpu.vector_store %arg7[%c0_9, %c0_10], %10 {strides = array<i32>} : memref<2x128xf32, #tpu.memory_space<vmem>>, vector<1x128xf32>,
    %c1 = arith.constant 1 : index
    %c0_11 = arith.constant 0 : index
    %12 = vector.load %arg7[%c1, %c0_11] : memref<2x128xf32, #tpu.memory_space<vmem>>, vector<1x128xf32>
    %13 = arith.mulf %5, %5 : vector<48x128xf32>
    %cst_12 = arith.constant dense<0.000000e+00> : vector<128xf32>
    %14 = vector.multi_reduction <add>, %13, %cst_12 [0] : vector<48x128xf32> to vector<128xf32>
    %15 = vector.shape_cast %14 : vector<128xf32> to vector<1x128xf32>
    %16 = arith.addf %12, %15 : vector<1x128xf32>
    %c1_13 = arith.constant 1 : index
    %c0_14 = arith.constant 0 : index
    %17 = vector.load %arg7[%c1_13, %c0_14] : memref<2x128xf32, #tpu.memory_space<vmem>>, vector<1x128xf32>
    tpu.vector_store %arg7[%c1_13, %c0_14], %16 {strides = array<i32>} : memref<2x128xf32, #tpu.memory_space<vmem>>, vector<1x128xf32>,
    %c2_i32 = arith.constant 2 : i32
    %18 = arith.cmpi eq, %arg0, %c2_i32 : i32
    %19 = arith.extui %18 : i1 to i32
    %c0_i32_15 = arith.constant 0 : i32
    %20 = arith.cmpi ne, %19, %c0_i32_15 : i32
    scf.if %20 {
      %c0_16 = arith.constant 0 : index
      %c0_17 = arith.constant 0 : index
      %21 = vector.load %arg7[%c0_16, %c0_17] : memref<2x128xf32, #tpu.memory_space<vmem>>, vector<1x128xf32>
      %cst_18 = arith.constant 7.812500e-03 : f32
      %22 = vector.broadcast %cst_18 : f32 to vector<1x128xf32>
      %23 = arith.mulf %21, %22 : vector<1x128xf32>
      %c1_19 = arith.constant 1 : index
      %c0_20 = arith.constant 0 : index
      %24 = vector.load %arg7[%c1_19, %c0_20] : memref<2x128xf32, #tpu.memory_space<vmem>>, vector<1x128xf32>
      %cst_21 = arith.constant 7.812500e-03 : f32
      %25 = vector.broadcast %cst_21 : f32 to vector<1x128xf32>
      %26 = arith.mulf %24, %25 : vector<1x128xf32>
      %27 = arith.mulf %23, %23 : vector<1x128xf32>
      %28 = arith.subf %26, %27 : vector<1x128xf32>
      %cst_22 = arith.constant 0.000000e+00 : f32
      %29 = vector.broadcast %cst_22 : f32 to vector<1x128xf32>
      %30 = arith.maximumf %28, %29 : vector<1x128xf32>
      %c0_23 = arith.constant 0 : index
      %c0_24 = arith.constant 0 : index
      %31 = vector.load %arg3[%c0_23, %c0_24] : memref<1x128xf32, #tpu.memory_space<vmem>>, vector<1x128xf32>
      %cst_25 = arith.constant 9.99999974E-6 : f32
      %32 = vector.broadcast %cst_25 : f32 to vector<1x128xf32>
      %33 = arith.addf %30, %32 : vector<1x128xf32>
      %34 = math.rsqrt %33 : vector<1x128xf32>
      %35 = arith.mulf %31, %34 : vector<1x128xf32>
      %c0_26 = arith.constant 0 : index
      %c0_27 = arith.constant 0 : index
      %36 = vector.load %arg6[%c0_26, %c0_27] : memref<2x128xf32, #tpu.memory_space<vmem>>, vector<1x128xf32>
      tpu.vector_store %arg6[%c0_26, %c0_27], %35 {strides = array<i32>} : memref<2x128xf32, #tpu.memory_space<vmem>>, vector<1x128xf32>,
      %c0_28 = arith.constant 0 : index
      %c0_29 = arith.constant 0 : index
      %37 = vector.load %arg4[%c0_28, %c0_29] : memref<1x128xf32, #tpu.memory_space<vmem>>, vector<1x128xf32>
      %38 = arith.mulf %23, %35 : vector<1x128xf32>
      %39 = arith.subf %37, %38 : vector<1x128xf32>
      %c1_30 = arith.constant 1 : index
      %c0_31 = arith.constant 0 : index
      %40 = vector.load %arg6[%c1_30, %c0_31] : memref<2x128xf32, #tpu.memory_space<vmem>>, vector<1x128xf32>
      tpu.vector_store %arg6[%c1_30, %c0_31], %39 {strides = array<i32>} : memref<2x128xf32, #tpu.memory_space<vmem>>, vector<1x128xf32>,
    } else {
    }
    return
  }
  func.func @transform_0(%arg0: i32) -> (i32, i32) {
    %c0_i32 = arith.constant 0 : i32
    %c0_i32_0 = arith.constant 0 : i32
    return %arg0, %c0_i32 : i32, i32
  }
  func.func @transform_1(%arg0: i32) -> (i32, i32) {
    %c0_i32 = arith.constant 0 : i32
    %c0_i32_0 = arith.constant 0 : i32
    %c0_i32_1 = arith.constant 0 : i32
    return %c0_i32, %c0_i32_0 : i32, i32
  }
  func.func @transform_2(%arg0: i32) -> (i32, i32) {
    %c0_i32 = arith.constant 0 : i32
    %c0_i32_0 = arith.constant 0 : i32
    %c0_i32_1 = arith.constant 0 : i32
    return %c0_i32, %c0_i32_0 : i32, i32
  }
  func.func @transform_3(%arg0: i32) -> (i32, i32) {
    %c0_i32 = arith.constant 0 : i32
    %c0_i32_0 = arith.constant 0 : i32
    %c0_i32_1 = arith.constant 0 : i32
    return %c0_i32, %c0_i32_0 : i32, i32
  }
  func.func @transform_4(%arg0: i32) -> (i32, i32) {
    %c0_i32 = arith.constant 0 : i32
    %c0_i32_0 = arith.constant 0 : i32
    return %arg0, %c0_i32 : i32, i32
  }
  func.func @transform_5(%arg0: i32) -> (i32, i32) {
    %c0_i32 = arith.constant 0 : i32
    %c0_i32_0 = arith.constant 0 : i32
    %c0_i32_1 = arith.constant 0 : i32
    return %c0_i32, %c0_i32_0 : i32, i32
  }
}

module attributes {stable_mosaic.version = 11 : i64} {
  func.func @merge_relu_kernel(%arg0: i32, %arg1: memref<48x128xf32, #tpu.memory_space<vmem>>, %arg2: memref<2x128xf32, #tpu.memory_space<vmem>>, %arg3: memref<48x128xf32, #tpu.memory_space<vmem>>, %arg4: memref<2x128xf32, #tpu.memory_space<vmem>>, %arg5: memref<48x128xf32, #tpu.memory_space<vmem>>) attributes {dimension_semantics = [#tpu.dimension_semantics<parallel>], iteration_bounds = array<i64: 3>, scalar_prefetch = 0 : i64, scratch_operands = 0 : i64, tpu.core_type = #tpu.core_type<tc>, window_params = [{transform_indices = @transform_0, window_bounds = array<i64: 48, 128>}, {pipeline_mode = #tpu.pipeline_mode<synchronous>, transform_indices = @transform_1, window_bounds = array<i64: 2, 128>}, {transform_indices = @transform_2, window_bounds = array<i64: 48, 128>}, {pipeline_mode = #tpu.pipeline_mode<synchronous>, transform_indices = @transform_3, window_bounds = array<i64: 2, 128>}, {transform_indices = @transform_4, window_bounds = array<i64: 48, 128>}]} {
    %c0 = arith.constant 0 : index
    %c0_0 = arith.constant 0 : index
    %0 = vector.load %arg1[%c0, %c0_0] : memref<48x128xf32, #tpu.memory_space<vmem>>, vector<48x128xf32>
    %c0_1 = arith.constant 0 : index
    %c0_2 = arith.constant 0 : index
    %1 = vector.load %arg2[%c0_1, %c0_2] : memref<2x128xf32, #tpu.memory_space<vmem>>, vector<1x128xf32>
    %2 = vector.broadcast %1 : vector<1x128xf32> to vector<48x128xf32>
    %3 = arith.mulf %0, %2 : vector<48x128xf32>
    %c1 = arith.constant 1 : index
    %c0_3 = arith.constant 0 : index
    %4 = vector.load %arg2[%c1, %c0_3] : memref<2x128xf32, #tpu.memory_space<vmem>>, vector<1x128xf32>
    %5 = vector.broadcast %4 : vector<1x128xf32> to vector<48x128xf32>
    %6 = arith.addf %3, %5 : vector<48x128xf32>
    %c0_4 = arith.constant 0 : index
    %c0_5 = arith.constant 0 : index
    %7 = vector.load %arg3[%c0_4, %c0_5] : memref<48x128xf32, #tpu.memory_space<vmem>>, vector<48x128xf32>
    %c0_6 = arith.constant 0 : index
    %c0_7 = arith.constant 0 : index
    %8 = vector.load %arg4[%c0_6, %c0_7] : memref<2x128xf32, #tpu.memory_space<vmem>>, vector<1x128xf32>
    %9 = vector.broadcast %8 : vector<1x128xf32> to vector<48x128xf32>
    %10 = arith.mulf %7, %9 : vector<48x128xf32>
    %11 = arith.addf %6, %10 : vector<48x128xf32>
    %c1_8 = arith.constant 1 : index
    %c0_9 = arith.constant 0 : index
    %12 = vector.load %arg4[%c1_8, %c0_9] : memref<2x128xf32, #tpu.memory_space<vmem>>, vector<1x128xf32>
    %13 = vector.broadcast %12 : vector<1x128xf32> to vector<48x128xf32>
    %14 = arith.addf %11, %13 : vector<48x128xf32>
    %cst = arith.constant 0.000000e+00 : f32
    %15 = vector.broadcast %cst : f32 to vector<48x128xf32>
    %16 = arith.maximumf %14, %15 : vector<48x128xf32>
    %c0_10 = arith.constant 0 : index
    %c0_11 = arith.constant 0 : index
    %17 = vector.load %arg5[%c0_10, %c0_11] : memref<48x128xf32, #tpu.memory_space<vmem>>, vector<48x128xf32>
    tpu.vector_store %arg5[%c0_10, %c0_11], %16 {strides = array<i32>} : memref<48x128xf32, #tpu.memory_space<vmem>>, vector<48x128xf32>,
    return
  }
  func.func @transform_0(%arg0: i32) -> (i32, i32) {
    %c0_i32 = arith.constant 0 : i32
    %c0_i32_0 = arith.constant 0 : i32
    return %arg0, %c0_i32 : i32, i32
  }
  func.func @transform_1(%arg0: i32) -> (i32, i32) {
    %c0_i32 = arith.constant 0 : i32
    %c0_i32_0 = arith.constant 0 : i32
    %c0_i32_1 = arith.constant 0 : i32
    return %c0_i32, %c0_i32_0 : i32, i32
  }
  func.func @transform_2(%arg0: i32) -> (i32, i32) {
    %c0_i32 = arith.constant 0 : i32
    %c0_i32_0 = arith.constant 0 : i32
    return %arg0, %c0_i32 : i32, i32
  }
  func.func @transform_3(%arg0: i32) -> (i32, i32) {
    %c0_i32 = arith.constant 0 : i32
    %c0_i32_0 = arith.constant 0 : i32
    %c0_i32_1 = arith.constant 0 : i32
    return %c0_i32, %c0_i32_0 : i32, i32
  }
  func.func @transform_4(%arg0: i32) -> (i32, i32) {
    %c0_i32 = arith.constant 0 : i32
    %c0_i32_0 = arith.constant 0 : i32
    return %arg0, %c0_i32 : i32, i32
  }
}

module attributes {stable_mosaic.version = 11 : i64} {
  func.func @dual_conv_stats_kernel(%arg0: i32, %arg1: memref<48x128xf32, #tpu.memory_space<vmem>>, %arg2: memref<2x128xf32, #tpu.memory_space<vmem>>, %arg3: memref<48x128xbf16, #tpu.memory_space<vmem>>, %arg4: memref<128x128xbf16, #tpu.memory_space<vmem>>, %arg5: memref<1x128xf32, #tpu.memory_space<vmem>>, %arg6: memref<1x128xf32, #tpu.memory_space<vmem>>, %arg7: memref<128x128xbf16, #tpu.memory_space<vmem>>, %arg8: memref<1x128xf32, #tpu.memory_space<vmem>>, %arg9: memref<1x128xf32, #tpu.memory_space<vmem>>, %arg10: memref<48x128xf32, #tpu.memory_space<vmem>>, %arg11: memref<48x128xf32, #tpu.memory_space<vmem>>, %arg12: memref<2x128xf32, #tpu.memory_space<vmem>>, %arg13: memref<2x128xf32, #tpu.memory_space<vmem>>, %arg14: memref<2x128xf32, #tpu.memory_space<vmem>>, %arg15: memref<2x128xf32, #tpu.memory_space<vmem>>) attributes {dimension_semantics = [#tpu.dimension_semantics<arbitrary>], iteration_bounds = array<i64: 3>, scalar_prefetch = 0 : i64, scratch_operands = 2 : i64, tpu.core_type = #tpu.core_type<tc>, window_params = [{transform_indices = @transform_0, window_bounds = array<i64: 48, 128>}, {pipeline_mode = #tpu.pipeline_mode<synchronous>, transform_indices = @transform_1, window_bounds = array<i64: 2, 128>}, {transform_indices = @transform_2, window_bounds = array<i64: 48, 128>}, {pipeline_mode = #tpu.pipeline_mode<synchronous>, transform_indices = @transform_3, window_bounds = array<i64: 128, 128>}, {pipeline_mode = #tpu.pipeline_mode<synchronous>, transform_indices = @transform_4, window_bounds = array<i64: 1, 128>}, {pipeline_mode = #tpu.pipeline_mode<synchronous>, transform_indices = @transform_5, window_bounds = array<i64: 1, 128>}, {pipeline_mode = #tpu.pipeline_mode<synchronous>, transform_indices = @transform_6, window_bounds = array<i64: 128, 128>}, {pipeline_mode = #tpu.pipeline_mode<synchronous>, transform_indices = @transform_7, window_bounds = array<i64: 1, 128>}, {pipeline_mode = #tpu.pipeline_mode<synchronous>, transform_indices = @transform_8, window_bounds = array<i64: 1, 128>}, {transform_indices = @transform_9, window_bounds = array<i64: 48, 128>}, {transform_indices = @transform_10, window_bounds = array<i64: 48, 128>}, {pipeline_mode = #tpu.pipeline_mode<synchronous>, transform_indices = @transform_11, window_bounds = array<i64: 2, 128>}, {pipeline_mode = #tpu.pipeline_mode<synchronous>, transform_indices = @transform_12, window_bounds = array<i64: 2, 128>}]} {
    %c0_i32 = arith.constant 0 : i32
    %0 = arith.cmpi eq, %arg0, %c0_i32 : i32
    %1 = arith.extui %0 : i1 to i32
    %c0_i32_0 = arith.constant 0 : i32
    %2 = arith.cmpi ne, %1, %c0_i32_0 : i32
    scf.if %2 {
      %cst_39 = arith.constant 0.000000e+00 : f32
      %55 = vector.broadcast %cst_39 : f32 to vector<2x128xf32>
      %c0_40 = arith.constant 0 : index
      %c0_41 = arith.constant 0 : index
      %56 = vector.load %arg14[%c0_40, %c0_41] : memref<2x128xf32, #tpu.memory_space<vmem>>, vector<2x128xf32>
      tpu.vector_store %arg14[%c0_40, %c0_41], %55 {strides = array<i32>} : memref<2x128xf32, #tpu.memory_space<vmem>>, vector<2x128xf32>,
      %cst_42 = arith.constant 0.000000e+00 : f32
      %57 = vector.broadcast %cst_42 : f32 to vector<2x128xf32>
      %c0_43 = arith.constant 0 : index
      %c0_44 = arith.constant 0 : index
      %58 = vector.load %arg15[%c0_43, %c0_44] : memref<2x128xf32, #tpu.memory_space<vmem>>, vector<2x128xf32>
      tpu.vector_store %arg15[%c0_43, %c0_44], %57 {strides = array<i32>} : memref<2x128xf32, #tpu.memory_space<vmem>>, vector<2x128xf32>,
    } else {
    }
    %c0 = arith.constant 0 : index
    %c0_1 = arith.constant 0 : index
    %3 = vector.load %arg1[%c0, %c0_1] : memref<48x128xf32, #tpu.memory_space<vmem>>, vector<48x128xf32>
    %c0_2 = arith.constant 0 : index
    %c0_3 = arith.constant 0 : index
    %4 = vector.load %arg2[%c0_2, %c0_3] : memref<2x128xf32, #tpu.memory_space<vmem>>, vector<1x128xf32>
    %5 = vector.broadcast %4 : vector<1x128xf32> to vector<48x128xf32>
    %6 = arith.mulf %3, %5 : vector<48x128xf32>
    %c1 = arith.constant 1 : index
    %c0_4 = arith.constant 0 : index
    %7 = vector.load %arg2[%c1, %c0_4] : memref<2x128xf32, #tpu.memory_space<vmem>>, vector<1x128xf32>
    %8 = vector.broadcast %7 : vector<1x128xf32> to vector<48x128xf32>
    %9 = arith.addf %6, %8 : vector<48x128xf32>
    %cst = arith.constant 0.000000e+00 : f32
    %10 = vector.broadcast %cst : f32 to vector<48x128xf32>
    %11 = arith.maximumf %9, %10 : vector<48x128xf32>
    %c48_i32 = arith.constant 48 : i32
    %12 = arith.muli %arg0, %c48_i32 : i32
    %13 = tpu.iota {dimensions = array<i32: 0>} : vector<48x1xi32>
    %14 = vector.broadcast %12 : i32 to vector<48x1xi32>
    %15 = arith.addi %14, %13 : vector<48x1xi32>
    %c128_i32 = arith.constant 128 : i32
    %16 = vector.broadcast %c128_i32 : i32 to vector<48x1xi32>
    %17 = arith.cmpi slt, %15, %16 : vector<48x1xi32>
    %cst_5 = arith.constant 0.000000e+00 : f32
    %18 = vector.shape_cast %17 : vector<48x1xi1> to vector<48x1xi1>
    %19 = vector.broadcast %18 : vector<48x1xi1> to vector<48x128xi1>
    %20 = vector.broadcast %cst_5 : f32 to vector<48x128xf32>
    %21 = arith.select %19, %11, %20 : vector<48x128xi1>, vector<48x128xf32>
    %22 = arith.truncf %21 : vector<48x128xf32> to vector<48x128xbf16>
    %c0_6 = arith.constant 0 : index
    %c0_7 = arith.constant 0 : index
    %23 = vector.load %arg4[%c0_6, %c0_7] : memref<128x128xbf16, #tpu.memory_space<vmem>>, vector<128x128xbf16>
    %cst_8 = arith.constant dense<0.000000e+00> : vector<48x128xf32>
    %24 = tpu.matmul %22, %23, %cst_8 {dimension_numbers = #tpu.dot_dimension_numbers<[1], [0], [0], [1], [0, 0, 1, 1], [], []>} : vector<48x128xbf16>, vector<128x128xbf16>, vector<48x128xf32> -> vector<48x128xf32>
    %c0_9 = arith.constant 0 : index
    %c0_10 = arith.constant 0 : index
    %25 = vector.load %arg3[%c0_9, %c0_10] : memref<48x128xbf16, #tpu.memory_space<vmem>>, vector<48x128xbf16>
    %c0_11 = arith.constant 0 : index
    %c0_12 = arith.constant 0 : index
    %26 = vector.load %arg7[%c0_11, %c0_12] : memref<128x128xbf16, #tpu.memory_space<vmem>>, vector<128x128xbf16>
    %cst_13 = arith.constant dense<0.000000e+00> : vector<48x128xf32>
    %27 = tpu.matmul %25, %26, %cst_13 {dimension_numbers = #tpu.dot_dimension_numbers<[1], [0], [0], [1], [0, 0, 1, 1], [], []>} : vector<48x128xbf16>, vector<128x128xbf16>, vector<48x128xf32> -> vector<48x128xf32>
    %c0_14 = arith.constant 0 : index
    %c0_15 = arith.constant 0 : index
    %28 = vector.load %arg10[%c0_14, %c0_15] : memref<48x128xf32, #tpu.memory_space<vmem>>, vector<48x128xf32>
    tpu.vector_store %arg10[%c0_14, %c0_15], %24 {strides = array<i32>} : memref<48x128xf32, #tpu.memory_space<vmem>>, vector<48x128xf32>,
    %c0_16 = arith.constant 0 : index
    %c0_17 = arith.constant 0 : index
    %29 = vector.load %arg11[%c0_16, %c0_17] : memref<48x128xf32, #tpu.memory_space<vmem>>, vector<48x128xf32>
    tpu.vector_store %arg11[%c0_16, %c0_17], %27 {strides = array<i32>} : memref<48x128xf32, #tpu.memory_space<vmem>>, vector<48x128xf32>,
    %c0_18 = arith.constant 0 : index
    %c0_19 = arith.constant 0 : index
    %30 = vector.load %arg14[%c0_18, %c0_19] : memref<2x128xf32, #tpu.memory_space<vmem>>, vector<1x128xf32>
    %cst_20 = arith.constant dense<0.000000e+00> : vector<128xf32>
    %31 = vector.multi_reduction <add>, %24, %cst_20 [0] : vector<48x128xf32> to vector<128xf32>
    %32 = vector.shape_cast %31 : vector<128xf32> to vector<1x128xf32>
    %33 = arith.addf %30, %32 : vector<1x128xf32>
    %c0_21 = arith.constant 0 : index
    %c0_22 = arith.constant 0 : index
    %34 = vector.load %arg14[%c0_21, %c0_22] : memref<2x128xf32, #tpu.memory_space<vmem>>, vector<1x128xf32>
    tpu.vector_store %arg14[%c0_21, %c0_22], %33 {strides = array<i32>} : memref<2x128xf32, #tpu.memory_space<vmem>>, vector<1x128xf32>,
    %c1_23 = arith.constant 1 : index
    %c0_24 = arith.constant 0 : index
    %35 = vector.load %arg14[%c1_23, %c0_24] : memref<2x128xf32, #tpu.memory_space<vmem>>, vector<1x128xf32>
    %36 = arith.mulf %24, %24 : vector<48x128xf32>
    %cst_25 = arith.constant dense<0.000000e+00> : vector<128xf32>
    %37 = vector.multi_reduction <add>, %36, %cst_25 [0] : vector<48x128xf32> to vector<128xf32>
    %38 = vector.shape_cast %37 : vector<128xf32> to vector<1x128xf32>
    %39 = arith.addf %35, %38 : vector<1x128xf32>
    %c1_26 = arith.constant 1 : index
    %c0_27 = arith.constant 0 : index
    %40 = vector.load %arg14[%c1_26, %c0_27] : memref<2x128xf32, #tpu.memory_space<vmem>>, vector<1x128xf32>
    tpu.vector_store %arg14[%c1_26, %c0_27], %39 {strides = array<i32>} : memref<2x128xf32, #tpu.memory_space<vmem>>, vector<1x128xf32>,
    %c0_28 = arith.constant 0 : index
    %c0_29 = arith.constant 0 : index
    %41 = vector.load %arg15[%c0_28, %c0_29] : memref<2x128xf32, #tpu.memory_space<vmem>>, vector<1x128xf32>
    %cst_30 = arith.constant dense<0.000000e+00> : vector<128xf32>
    %42 = vector.multi_reduction <add>, %27, %cst_30 [0] : vector<48x128xf32> to vector<128xf32>
    %43 = vector.shape_cast %42 : vector<128xf32> to vector<1x128xf32>
    %44 = arith.addf %41, %43 : vector<1x128xf32>
    %c0_31 = arith.constant 0 : index
    %c0_32 = arith.constant 0 : index
    %45 = vector.load %arg15[%c0_31, %c0_32] : memref<2x128xf32, #tpu.memory_space<vmem>>, vector<1x128xf32>
    tpu.vector_store %arg15[%c0_31, %c0_32], %44 {strides = array<i32>} : memref<2x128xf32, #tpu.memory_space<vmem>>, vector<1x128xf32>,
    %c1_33 = arith.constant 1 : index
    %c0_34 = arith.constant 0 : index
    %46 = vector.load %arg15[%c1_33, %c0_34] : memref<2x128xf32, #tpu.memory_space<vmem>>, vector<1x128xf32>
    %47 = arith.mulf %27, %27 : vector<48x128xf32>
    %cst_35 = arith.constant dense<0.000000e+00> : vector<128xf32>
    %48 = vector.multi_reduction <add>, %47, %cst_35 [0] : vector<48x128xf32> to vector<128xf32>
    %49 = vector.shape_cast %48 : vector<128xf32> to vector<1x128xf32>
    %50 = arith.addf %46, %49 : vector<1x128xf32>
    %c1_36 = arith.constant 1 : index
    %c0_37 = arith.constant 0 : index
    %51 = vector.load %arg15[%c1_36, %c0_37] : memref<2x128xf32, #tpu.memory_space<vmem>>, vector<1x128xf32>
    tpu.vector_store %arg15[%c1_36, %c0_37], %50 {strides = array<i32>} : memref<2x128xf32, #tpu.memory_space<vmem>>, vector<1x128xf32>,
    %c2_i32 = arith.constant 2 : i32
    %52 = arith.cmpi eq, %arg0, %c2_i32 : i32
    %53 = arith.extui %52 : i1 to i32
    %c0_i32_38 = arith.constant 0 : i32
    %54 = arith.cmpi ne, %53, %c0_i32_38 : i32
    scf.if %54 {
      %c0_39 = arith.constant 0 : index
      %c0_40 = arith.constant 0 : index
      %55 = vector.load %arg14[%c0_39, %c0_40] : memref<2x128xf32, #tpu.memory_space<vmem>>, vector<1x128xf32>
      %cst_41 = arith.constant 7.812500e-03 : f32
      %56 = vector.broadcast %cst_41 : f32 to vector<1x128xf32>
      %57 = arith.mulf %55, %56 : vector<1x128xf32>
      %c1_42 = arith.constant 1 : index
      %c0_43 = arith.constant 0 : index
      %58 = vector.load %arg14[%c1_42, %c0_43] : memref<2x128xf32, #tpu.memory_space<vmem>>, vector<1x128xf32>
      %cst_44 = arith.constant 7.812500e-03 : f32
      %59 = vector.broadcast %cst_44 : f32 to vector<1x128xf32>
      %60 = arith.mulf %58, %59 : vector<1x128xf32>
      %61 = arith.mulf %57, %57 : vector<1x128xf32>
      %62 = arith.subf %60, %61 : vector<1x128xf32>
      %cst_45 = arith.constant 0.000000e+00 : f32
      %63 = vector.broadcast %cst_45 : f32 to vector<1x128xf32>
      %64 = arith.maximumf %62, %63 : vector<1x128xf32>
      %c0_46 = arith.constant 0 : index
      %c0_47 = arith.constant 0 : index
      %65 = vector.load %arg5[%c0_46, %c0_47] : memref<1x128xf32, #tpu.memory_space<vmem>>, vector<1x128xf32>
      %cst_48 = arith.constant 9.99999974E-6 : f32
      %66 = vector.broadcast %cst_48 : f32 to vector<1x128xf32>
      %67 = arith.addf %64, %66 : vector<1x128xf32>
      %68 = math.rsqrt %67 : vector<1x128xf32>
      %69 = arith.mulf %65, %68 : vector<1x128xf32>
      %c0_49 = arith.constant 0 : index
      %c0_50 = arith.constant 0 : index
      %70 = vector.load %arg12[%c0_49, %c0_50] : memref<2x128xf32, #tpu.memory_space<vmem>>, vector<1x128xf32>
      tpu.vector_store %arg12[%c0_49, %c0_50], %69 {strides = array<i32>} : memref<2x128xf32, #tpu.memory_space<vmem>>, vector<1x128xf32>,
      %c0_51 = arith.constant 0 : index
      %c0_52 = arith.constant 0 : index
      %71 = vector.load %arg6[%c0_51, %c0_52] : memref<1x128xf32, #tpu.memory_space<vmem>>, vector<1x128xf32>
      %72 = arith.mulf %57, %69 : vector<1x128xf32>
      %73 = arith.subf %71, %72 : vector<1x128xf32>
      %c1_53 = arith.constant 1 : index
      %c0_54 = arith.constant 0 : index
      %74 = vector.load %arg12[%c1_53, %c0_54] : memref<2x128xf32, #tpu.memory_space<vmem>>, vector<1x128xf32>
      tpu.vector_store %arg12[%c1_53, %c0_54], %73 {strides = array<i32>} : memref<2x128xf32, #tpu.memory_space<vmem>>, vector<1x128xf32>,
      %c0_55 = arith.constant 0 : index
      %c0_56 = arith.constant 0 : index
      %75 = vector.load %arg15[%c0_55, %c0_56] : memref<2x128xf32, #tpu.memory_space<vmem>>, vector<1x128xf32>
      %cst_57 = arith.constant 7.812500e-03 : f32
      %76 = vector.broadcast %cst_57 : f32 to vector<1x128xf32>
      %77 = arith.mulf %75, %76 : vector<1x128xf32>
      %c1_58 = arith.constant 1 : index
      %c0_59 = arith.constant 0 : index
      %78 = vector.load %arg15[%c1_58, %c0_59] : memref<2x128xf32, #tpu.memory_space<vmem>>, vector<1x128xf32>
      %cst_60 = arith.constant 7.812500e-03 : f32
      %79 = vector.broadcast %cst_60 : f32 to vector<1x128xf32>
      %80 = arith.mulf %78, %79 : vector<1x128xf32>
      %81 = arith.mulf %77, %77 : vector<1x128xf32>
      %82 = arith.subf %80, %81 : vector<1x128xf32>
      %cst_61 = arith.constant 0.000000e+00 : f32
      %83 = vector.broadcast %cst_61 : f32 to vector<1x128xf32>
      %84 = arith.maximumf %82, %83 : vector<1x128xf32>
      %c0_62 = arith.constant 0 : index
      %c0_63 = arith.constant 0 : index
      %85 = vector.load %arg8[%c0_62, %c0_63] : memref<1x128xf32, #tpu.memory_space<vmem>>, vector<1x128xf32>
      %cst_64 = arith.constant 9.99999974E-6 : f32
      %86 = vector.broadcast %cst_64 : f32 to vector<1x128xf32>
      %87 = arith.addf %84, %86 : vector<1x128xf32>
      %88 = math.rsqrt %87 : vector<1x128xf32>
      %89 = arith.mulf %85, %88 : vector<1x128xf32>
      %c0_65 = arith.constant 0 : index
      %c0_66 = arith.constant 0 : index
      %90 = vector.load %arg13[%c0_65, %c0_66] : memref<2x128xf32, #tpu.memory_space<vmem>>, vector<1x128xf32>
      tpu.vector_store %arg13[%c0_65, %c0_66], %89 {strides = array<i32>} : memref<2x128xf32, #tpu.memory_space<vmem>>, vector<1x128xf32>,
      %c0_67 = arith.constant 0 : index
      %c0_68 = arith.constant 0 : index
      %91 = vector.load %arg9[%c0_67, %c0_68] : memref<1x128xf32, #tpu.memory_space<vmem>>, vector<1x128xf32>
      %92 = arith.mulf %77, %89 : vector<1x128xf32>
      %93 = arith.subf %91, %92 : vector<1x128xf32>
      %c1_69 = arith.constant 1 : index
      %c0_70 = arith.constant 0 : index
      %94 = vector.load %arg13[%c1_69, %c0_70] : memref<2x128xf32, #tpu.memory_space<vmem>>, vector<1x128xf32>
      tpu.vector_store %arg13[%c1_69, %c0_70], %93 {strides = array<i32>} : memref<2x128xf32, #tpu.memory_space<vmem>>, vector<1x128xf32>,
    } else {
    }
    return
  }
  func.func @transform_0(%arg0: i32) -> (i32, i32) {
    %c0_i32 = arith.constant 0 : i32
    %c0_i32_0 = arith.constant 0 : i32
    return %arg0, %c0_i32 : i32, i32
  }
  func.func @transform_1(%arg0: i32) -> (i32, i32) {
    %c0_i32 = arith.constant 0 : i32
    %c0_i32_0 = arith.constant 0 : i32
    %c0_i32_1 = arith.constant 0 : i32
    return %c0_i32, %c0_i32_0 : i32, i32
  }
  func.func @transform_2(%arg0: i32) -> (i32, i32) {
    %c0_i32 = arith.constant 0 : i32
    %c0_i32_0 = arith.constant 0 : i32
    return %arg0, %c0_i32 : i32, i32
  }
  func.func @transform_3(%arg0: i32) -> (i32, i32) {
    %c0_i32 = arith.constant 0 : i32
    %c0_i32_0 = arith.constant 0 : i32
    %c0_i32_1 = arith.constant 0 : i32
    return %c0_i32, %c0_i32_0 : i32, i32
  }
  func.func @transform_4(%arg0: i32) -> (i32, i32) {
    %c0_i32 = arith.constant 0 : i32
    %c0_i32_0 = arith.constant 0 : i32
    %c0_i32_1 = arith.constant 0 : i32
    return %c0_i32, %c0_i32_0 : i32, i32
  }
  func.func @transform_5(%arg0: i32) -> (i32, i32) {
    %c0_i32 = arith.constant 0 : i32
    %c0_i32_0 = arith.constant 0 : i32
    %c0_i32_1 = arith.constant 0 : i32
    return %c0_i32, %c0_i32_0 : i32, i32
  }
  func.func @transform_6(%arg0: i32) -> (i32, i32) {
    %c0_i32 = arith.constant 0 : i32
    %c0_i32_0 = arith.constant 0 : i32
    %c0_i32_1 = arith.constant 0 : i32
    return %c0_i32, %c0_i32_0 : i32, i32
  }
  func.func @transform_7(%arg0: i32) -> (i32, i32) {
    %c0_i32 = arith.constant 0 : i32
    %c0_i32_0 = arith.constant 0 : i32
    %c0_i32_1 = arith.constant 0 : i32
    return %c0_i32, %c0_i32_0 : i32, i32
  }
  func.func @transform_8(%arg0: i32) -> (i32, i32) {
    %c0_i32 = arith.constant 0 : i32
    %c0_i32_0 = arith.constant 0 : i32
    %c0_i32_1 = arith.constant 0 : i32
    return %c0_i32, %c0_i32_0 : i32, i32
  }
  func.func @transform_9(%arg0: i32) -> (i32, i32) {
    %c0_i32 = arith.constant 0 : i32
    %c0_i32_0 = arith.constant 0 : i32
    return %arg0, %c0_i32 : i32, i32
  }
  func.func @transform_10(%arg0: i32) -> (i32, i32) {
    %c0_i32 = arith.constant 0 : i32
    %c0_i32_0 = arith.constant 0 : i32
    return %arg0, %c0_i32 : i32, i32
  }
  func.func @transform_11(%arg0: i32) -> (i32, i32) {
    %c0_i32 = arith.constant 0 : i32
    %c0_i32_0 = arith.constant 0 : i32
    %c0_i32_1 = arith.constant 0 : i32
    return %c0_i32, %c0_i32_0 : i32, i32
  }
  func.func @transform_12(%arg0: i32) -> (i32, i32) {
    %c0_i32 = arith.constant 0 : i32
    %c0_i32_0 = arith.constant 0 : i32
    %c0_i32_1 = arith.constant 0 : i32
    return %c0_i32, %c0_i32_0 : i32, i32
  }
}

</mosaic_0001>

<bundles_post_ra>
// kernel: conv_block_forward.6
= control target key start
LH: loop header
LB: loop body
LE: loop exit
PB: predicated region body
PF: predicated region fallthrough
CT: control target
= control target key end

     0   :  { %s302_s9 = smov 0   ;;  %s325_s0 = inlined_call_operand.vmem [shape: f32[144,128], index: 0, kind: input, shape index: {}]   ;;  %s326_s1 = inlined_call_operand.vmem [shape: f32[2,128], index: 1, kind: input, shape index: {}]   ;;  %s327_s2 = inlined_call_operand.vmem [shape: bf16[144,128], index: 2, kind: output, shape index: {}]  }
   0x1 LB: > { %s243_s10 = sadd.s32 4294967295, %s285_s9   ;;  %p247_p0 = scmp.ge.s32.totalorder %s285_s9, 1  ;;  %s285_s9 = sphi %s302_s9, %s12_s9  }
   0x2   : > { %p113_p1 = scmp.lt.s32.totalorder %s285_s9, 4 }
   0x4   : > { %p114_p2 = pnand %p247_p0, %p113_p1 }
   0x5   : > { %s135_s11 = smul.u32 (!%p114_p2), 6, %s243_s10 }
   0x6   : > { %117 = sbr.rel (%p114_p2) target bundleno = 26 (0x1a), region = 28 }
   0x7   : > { %p136_p3 = scmp.lt.s32.totalorder (!%p114_p2), %s135_s11, 17 }
   0xb   : > { %s329_s11 = smov (!%p136_p3, %s135_s11), 17  ;;  %v277_v0 = vld [vmem:[%s326_s1] ss:$0 sm:$0xff]  ;;  %v278_v1 = vld [vmem:[%s326_s1 + $0x1] ss:$0 sm:$0xff] }
   0xc   : > { %s248_s14 = sshll.u32 %s329_s11, 3  ;;  %s249_s20 = sshll.u32 %s329_s11, 2 }
   0xd   : > { %s139_s17 = scalar_lea.vmem %s325_s0, %s248_s14  ;;  %s145_s23 = scalar_lea.vmem %s327_s2, %s249_s20 }
   0xe   : > { %v147_v2 = vld [vmem:[%s139_s17] sm:$0xff]  ;;  %v148_v3 = vld [vmem:[%s139_s17 + $0x8] sm:$0xff]  ;;  %v149_v4 = vld [vmem:[%s139_s17 + $0x10] sm:$0xff] }
   0xf   : > { %v155_v5 = vmul.f32 %v277_v0, %v147_v2  ;;  %v156_v6 = vmul.f32 %v277_v0, %v148_v3  ;;  %v150_v7 = vld [vmem:[%s139_s17 + $0x18] sm:$0xff]  ;;  %v157_v8 = vmul.f32 %v277_v0, %v149_v4  ;;  %v151_v9 = vld [vmem:[%s139_s17 + $0x20] sm:$0xff]  ;;  %v152_v10 = vld [vmem:[%s139_s17 + $0x28] sm:$0xff] }
  0x10   : > { %v158_v11 = vmul.f32 %v277_v0, %v150_v7  ;;  %v159_v12 = vmul.f32 %v277_v0, %v151_v9  ;;  %v160_v13 = vmul.f32 %v277_v0, %v152_v10 }
  0x11   : > { %v163_v14 = vadd.f32 %v278_v1, %v155_v5  ;;  %v164_v15 = vadd.f32 %v278_v1, %v156_v6  ;;  %v165_v16 = vadd.f32 %v278_v1, %v157_v8 }
  0x12   : > { %v166_v17 = vadd.f32 %v278_v1, %v158_v11  ;;  %v167_v18 = vadd.f32 %v278_v1, %v159_v12  ;;  %v168_v19 = vadd.f32 %v278_v1, %v160_v13 }
  0x13   : > { %v169_v20 = vmax.f32 %v163_v14, 0.0  ;;  %v170_v21 = vmax.f32 %v164_v15, 0.0  ;;  %v171_v22 = vmax.f32 %v165_v16, 0.0 }
  0x14   : > { %v172_v23 = vmax.f32 %v166_v17, 0.0  ;;  %v173_v24 = vmax.f32 %v167_v18, 0.0  ;;  %v174_v25 = vmax.f32 %v168_v19, 0.0 }
  0x15   : > { %v255_v26 = vpack.c.bf16 %v170_v21, %v169_v20 }
  0x16   : > { %v260_v27 = vpack.c.bf16 %v172_v23, %v171_v22  ;;  %v265_v28 = vpack.c.bf16 %v174_v25, %v173_v24 }
  0x17   : > { %256 = vst [vmem:[%s145_s23] sm:$0xff] %v255_v26  }
  0x18   : > { %267 = vst [vmem:[%s145_s23 + $0x8] sm:$0xff] %v260_v27  }
  0x19   : > { %268 = vst [vmem:[%s145_s23 + $0x10] sm:$0xff] %v265_v28  }
  0x1a PF: > { %s12_s9 = sadd.s32 1, %s285_s9  }
  0x1b   : > { %p9_p4 = scmp.ge.s32.totalorder %s12_s9, 5  }
  0x1d   :  { %11 = sbr.rel (!%p9_p4) target bundleno = 1 (0x1), region = 58 }

// kernel: conv_block_forward.5
= control target key start
LH: loop header
LB: loop body
LE: loop exit
PB: predicated region body
PF: predicated region fallthrough
CT: control target
= control target key end

     0   :  { %s606_s18 = smov 0   ;;  %s677_s0 = inlined_call_operand.vmem [shape: bf16[144,128], index: 0, kind: input, shape index: {}]   ;;  %s678_s1 = inlined_call_operand.vmem [shape: bf16[128,128], index: 1, kind: input, shape index: {}]   ;;  %s679_s2 = inlined_call_operand.vmem [shape: f32[1,128], index: 2, kind: input, shape index: {}]   ;;  %s680_s3 = inlined_call_operand.vmem [shape: f32[1,128], index: 3, kind: input, shape index: {}]   ;;  %s681_s4 = inlined_call_operand.vmem [shape: f32[144,128], index: 4, kind: output, shape index: {0}]   ;;  %s682_s5 = inlined_call_operand.vmem [shape: f32[2,128], index: 5, kind: output, shape index: {1}]  }
   0x1 LB: > { %s612_s19 = sadd.s32 4294967295, %s573_s18   ;;  %p478_p0 = scmp.ge.s32.totalorder %s573_s18, 1  ;;  %s573_s18 = sphi %s606_s18, %s16_s18  }
   0x2   : > { %p186_p1 = scmp.lt.s32.totalorder %s573_s18, 4 }
   0x4   : > { %p187_p2 = pnand %p478_p0, %p186_p1 }
   0x5   : > { %s214_s20 = smul.u32 (!%p187_p2), 6, %s612_s19  ;;  %p481_p4 = scmp.ne.s32.totalorder (!%p187_p2), %s612_s19, 0 }
   0x6   : > { %190 = sbr.rel (%p187_p2) target bundleno = 251 (0xfb), region = 36 }
   0x7   : > { %p215_p3 = scmp.lt.s32.totalorder (!%p187_p2), %s214_s20, 17 }
   0xb   : > { %s684_s20 = smov (!%p215_p3, %s214_s20), 17  ;;  %229 = sbr.rel (%p481_p4) target bundleno = 18 (0x12), region = 40 }
   0xc   : > { %s479_s21 = sshll.u32 %s684_s20, 2  ;;  %s480_s22 = sshll.u32 %s684_s20, 3 }
   0xd   : > { %s620_s25 = scalar_lea.vmem %s677_s0, %s479_s21  ;;  %s625_s28 = scalar_lea.vmem %s681_s4, %s480_s22 }
  0x10   : > { %v575_v0 = vmov 0.0  }
  0x11   : > { %230 = vst [vmem:[#allocation2] sm:$0x3] %v575_v0 }
  0x12 PF: > { %v539_v1 = vld [vmem:[%s678_s1 + $0x38] sm:$0xff]  ;;  %v538_v2 = vld [vmem:[%s678_s1 + $0x30] sm:$0xff]  ;;  %v537_v3 = vld [vmem:[%s678_s1 + $0x28] sm:$0xff]  ;;  %p526_p5 = scmp.ne.s32.totalorder %s612_s19, 2 }
  0x13   : > { %319 = vmatpush.bf16.msra.mxu0 %v539_v1  ;;  %540 = vmatpush.bf16.msra.mxu1 %v539_v1  ;;  %v536_v4 = vld [vmem:[%s678_s1 + $0x20] sm:$0xff]  ;;  %v535_v5 = vld [vmem:[%s678_s1 + $0x18] sm:$0xff]  ;;  %v534_v6 = vld [vmem:[%s678_s1 + $0x10] sm:$0xff] }
  0x14   : > { %541 = vmatpush.bf16.msra.mxu2 %v539_v1  ;;  %v533_v7 = vld [vmem:[%s678_s1 + $0x8] sm:$0xff]  ;;  %v532_v8 = vld [vmem:[%s678_s1] sm:$0xff]  ;;  %v531_v11 = vld [vmem:[%s620_s25 + $0x10] sm:$0xff] }
  0x15   : > { %v529_v9 = vld [vmem:[%s620_s25] sm:$0xff]  ;;  %v530_v10 = vld [vmem:[%s620_s25 + $0x8] sm:$0xff] }
  0x17   : > { %320 = vmatpush.bf16.msra.mxu0 %v538_v2  ;;  %542 = vmatpush.bf16.msra.mxu1 %v538_v2 }
  0x18   : > { %543 = vmatpush.bf16.msra.mxu2 %v538_v2  ;;  %v349_v43 = vld [vmem:[#allocation2] sm:$0x1]  ;;  %v363_v46 = vld [vmem:[#allocation2 + $0x1] sm:$0x1] }
  0x1b   : > { %321 = vmatpush.bf16.msra.mxu0 %v537_v3  ;;  %544 = vmatpush.bf16.msra.mxu1 %v537_v3 }
  0x1c   : > { %545 = vmatpush.bf16.msra.mxu2 %v537_v3 }
  0x1f   : > { %322 = vmatpush.bf16.msra.mxu0 %v536_v4  ;;  %546 = vmatpush.bf16.msra.mxu1 %v536_v4 }
  0x20   : > { %547 = vmatpush.bf16.msra.mxu2 %v536_v4 }
  0x23   : > { %323 = vmatpush.bf16.msra.mxu0 %v535_v5  ;;  %548 = vmatpush.bf16.msra.mxu1 %v535_v5 }
  0x24   : > { %549 = vmatpush.bf16.msra.mxu2 %v535_v5 }
  0x27   : > { %324 = vmatpush.bf16.msra.mxu0 %v534_v6  ;;  %550 = vmatpush.bf16.msra.mxu1 %v534_v6 }
  0x28   : > { %551 = vmatpush.bf16.msra.mxu2 %v534_v6 }
  0x2b   : > { %325 = vmatpush.bf16.msra.mxu0 %v533_v7  ;;  %552 = vmatpush.bf16.msra.mxu1 %v533_v7 }
  0x2c   : > { %553 = vmatpush.bf16.msra.mxu2 %v533_v7 }
  0x2f   : > { %326 = vmatpush.bf16.msra.mxu0 %v532_v8  ;;  %554 = vmatpush.bf16.msra.mxu1 %v532_v8 }
  0x30   : > { %555 = vmatpush.bf16.msra.mxu2 %v532_v8 }
  0x32   : > { %327 = vmatmul.bf16.vlgmr.msra.gmra.mxu0 %v529_v9  ;;  %332 = vmatmul.bf16.vlgmr.msra.gmra.mxu1 %v530_v10 }
  0x33   : > { %337 = vmatmul.bf16.vlgmr.msra.gmra.mxu2 %v531_v11 }
  0xaf   : > { %v328_v12 = vpop.f32.mrf.mxu0  ;;  %v333_v13 = vpop.f32.mrf.mxu1 }
  0xb0   : > { %343 = vst [vmem:[%s625_s28] sm:$0xff] %v328_v12  ;;  %v364_v17 = vmul.f32 %v328_v12, %v328_v12  ;;  %v366_v20 = vmul.f32 %v333_v13, %v333_v13 }
  0xb1   : > { %345 = vst [vmem:[%s625_s28 + $0x10] sm:$0xff] %v333_v13 }
  0xb6   : > { %v338_v14 = vpop.f32.mrf.mxu2 }
  0xb7   : > { %347 = vst [vmem:[%s625_s28 + $0x20] sm:$0xff] %v338_v14  ;;  %v330_v15 = vpop.f32.mrf.mxu0  ;;  %v335_v16 = vpop.f32.mrf.mxu1  ;;  %v368_v26 = vmul.f32 %v338_v14, %v338_v14 }
  0xb8   : > { %344 = vst [vmem:[%s625_s28 + $0x8] sm:$0xff] %v330_v15  ;;  %v350_v18 = vadd.f32 %v330_v15, %v328_v12  ;;  %v365_v19 = vmul.f32 %v330_v15, %v330_v15  ;;  %v367_v24 = vmul.f32 %v335_v16, %v335_v16 }
  0xb9   : > { %346 = vst [vmem:[%s625_s28 + $0x18] sm:$0xff] %v335_v16 }
  0xba   : > { %v370_v21 = vadd.f32 %v365_v19, %v364_v17  ;;  %v351_v22 = vadd.f32 %v350_v18, %v333_v13 }
  0xbc   : > { %v352_v23 = vadd.f32 %v351_v22, %v335_v16  ;;  %v371_v25 = vadd.f32 %v370_v21, %v366_v20 }
  0xbe   : > { %v372_v27 = vadd.f32 %v371_v25, %v367_v24  ;;  %v340_v28 = vpop.f32.mrf.mxu2  ;;  %v353_v29 = vadd.f32 %v352_v23, %v338_v14 }
  0xbf   : > { %348 = vst [vmem:[%s625_s28 + $0x28] sm:$0xff] %v340_v28  ;;  %v369_v31 = vmul.f32 %v340_v28, %v340_v28 }
  0xc0   : > { %v354_v30 = vadd.f32 %v353_v29, %v340_v28  ;;  %v373_v32 = vadd.f32 %v372_v27, %v368_v26 }
  0xc2   : > { %v355_v33 = vrot.slane %v354_v30, 4  ;;  %v374_v34 = vadd.f32 %v373_v32, %v369_v31 }
  0xc4   : > { %v356_v35 = vadd.f32 %v355_v33, %v354_v30  ;;  %v375_v36 = vrot.slane %v374_v34, 4 }
  0xc6   : > { %v357_v37 = vrot.slane %v356_v35, 2  ;;  %v376_v38 = vadd.f32 %v375_v36, %v374_v34 }
  0xc8   : > { %v358_v39 = vadd.f32 %v357_v37, %v356_v35  ;;  %v377_v40 = vrot.slane %v376_v38, 2 }
  0xca   : > { %v359_v41 = vrot.slane %v358_v39, 1  ;;  %v378_v42 = vadd.f32 %v377_v40, %v376_v38 }
  0xcc   : > { %v360_v44 = vadd.f32 %v359_v41, %v358_v39  ;;  %v379_v45 = vrot.slane %v378_v42, 1 }
  0xce   : > { %v361_v47 = vadd.f32 %v360_v44, %v349_v43  ;;  %v380_v48 = vadd.f32 %v379_v45, %v378_v42  ;;  %386 = sbr.rel (%p526_p5) target bundleno = 251 (0xfb), region = 44 }
  0xd0   : > { %362 = vst [vmem:[#allocation2] sm:$0x1] %v361_v47  ;;  %v381_v49 = vadd.f32 %v380_v48, %v363_v46 }
  0xd2   : > { %382 = vst [vmem:[#allocation2 + $0x1] sm:$0x1] %v381_v49 }
  0xd3   : > { %v394_v63 = vld [vmem:[%s679_s2] sm:$0x1] }
  0xd4   : > { %v408_v3 = vld [vmem:[%s680_s3] sm:$0x1] }
  0xd7   : > { %v387_v50 = vld [vmem:[#allocation2] sm:$0x1] }
  0xd8   : > { %v388_v52 = vmul.f32 0.0078125, %v387_v50 }
  0xd9   : > { %v389_v51 = vld [vmem:[#allocation2 + $0x1] sm:$0x1] }
  0xda   : > { %v390_v53 = vmul.f32 0.0078125, %v389_v51  ;;  %v391_v54 = vmul.f32 %v388_v52, %v388_v52 }
  0xdc   : > { %v392_v55 = vsub.f32 %v390_v53, %v391_v54 }
  0xde   : > { %v393_v56 = vmax.f32 %v392_v55, 0.0 }
  0xe0   : > { %v395_v57 = vadd.f32 1e-05, %v393_v56 }
  0xe2   : > { %565 = vrsqrt.f32 %v395_v57  ;;  %vm402_vm0 = vweird.f32 %v395_v57 }
  0xe8   : > { %v566_v58 = vpop.eup %565 }
  0xe9   : > { %v397_v59 = vmul.f32 %v566_v58, %v395_v57  ;;  %vm403_vm1 = vweird.f32 %v566_v58 }
  0xea   : > { %vm404_vm2 = vmor %vm402_vm0, %vm403_vm1 }
  0xeb   : > { %v398_v60 = vmul.f32 %v566_v58, %v397_v59 }
  0xed   : > { %v399_v61 = vmul.f32 0.5, %v398_v60 }
  0xef   : > { %v400_v62 = vsub.f32 1.5, %v399_v61 }
  0xf1   : > { %v401_v0 = vmul.f32 %v566_v58, %v400_v62 }
  0xf3   : > { %v405_v1 = vsel %vm404_vm2, %v566_v58, %v401_v0 }
  0xf4   : > { %v406_v2 = vmul.f32 %v405_v1, %v394_v63 }
  0xf6   : > { %407 = vst [vmem:[%s682_s5] sm:$0x1] %v406_v2  ;;  %v409_v4 = vmul.f32 %v406_v2, %v388_v52 }
  0xf8   : > { %v410_v5 = vsub.f32 %v408_v3, %v409_v4 }
  0xfa   : > { %411 = vst [vmem:[%s682_s5 + $0x1] sm:$0x1] %v410_v5 }
  0xfb PF: > { %s16_s18 = sadd.s32 1, %s573_s18  }
  0xfc   : > { %p13_p6 = scmp.ge.s32.totalorder %s16_s18, 5  }
  0xfe   :  { %15 = sbr.rel (!%p13_p6) target bundleno = 1 (0x1), region = 82 }

// kernel: conv_block_forward.9
= control target key start
LH: loop header
LB: loop body
LE: loop exit
PB: predicated region body
PF: predicated region fallthrough
CT: control target
= control target key end

     0   :  { %s408_s15 = smov 0   ;;  %s445_s0 = inlined_call_operand.vmem [shape: f32[144,128], index: 0, kind: input, shape index: {}]   ;;  %s446_s1 = inlined_call_operand.vmem [shape: f32[2,128], index: 1, kind: input, shape index: {}]   ;;  %s447_s2 = inlined_call_operand.vmem [shape: f32[144,128], index: 2, kind: input, shape index: {}]   ;;  %s448_s3 = inlined_call_operand.vmem [shape: f32[2,128], index: 3, kind: input, shape index: {}]   ;;  %s449_s4 = inlined_call_operand.vmem [shape: f32[144,128], index: 4, kind: output, shape index: {}]  }
   0x1 LB: > { %s353_s16 = sadd.s32 4294967295, %s381_s15   ;;  %p357_p0 = scmp.ge.s32.totalorder %s381_s15, 1  ;;  %s381_s15 = sphi %s408_s15, %s14_s15  }
   0x2   : > { %p174_p1 = scmp.lt.s32.totalorder %s381_s15, 4 }
   0x4   : > { %p175_p2 = pnand %p357_p0, %p174_p1 }
   0x5   : > { %s205_s17 = smul.u32 (!%p175_p2), 6, %s353_s16 }
   0x6   : > { %178 = sbr.rel (%p175_p2) target bundleno = 31 (0x1f), region = 36 }
   0x7   : > { %p206_p3 = scmp.lt.s32.totalorder (!%p175_p2), %s205_s17, 17 }
   0xb   : > { %s451_s17 = smov (!%p206_p3, %s205_s17), 17  ;;  %v371_v0 = vld [vmem:[%s446_s1] ss:$0 sm:$0xff]  ;;  %v372_v2 = vld [vmem:[%s446_s1 + $0x1] ss:$0 sm:$0xff] }
   0xc   : > { %v373_v1 = vld [vmem:[%s448_s3] ss:$0 sm:$0xff]  ;;  %s422_s22 = sshll.u32 %s451_s17, 3  ;;  %v374_v8 = vld [vmem:[%s448_s3 + $0x1] ss:$0 sm:$0xff] }
   0xd   : > { %s209_s25 = scalar_lea.vmem %s445_s0, %s422_s22  ;;  %s215_s28 = scalar_lea.vmem %s447_s2, %s422_s22 }
   0xe   : > { %v223_v3 = vld [vmem:[%s209_s25] sm:$0xff]  ;;  %v224_v5 = vld [vmem:[%s209_s25 + $0x8] sm:$0xff]  ;;  %v225_v11 = vld [vmem:[%s209_s25 + $0x10] sm:$0xff]  ;;  %s221_s9 = scalar_lea.vmem %s449_s4, %s422_s22 }
   0xf   : > { %v245_v4 = vld [vmem:[%s215_s28] sm:$0xff]  ;;  %v231_v6 = vmul.f32 %v371_v0, %v223_v3  ;;  %v232_v9 = vmul.f32 %v371_v0, %v224_v5  ;;  %v246_v10 = vld [vmem:[%s215_s28 + $0x8] sm:$0xff]  ;;  %v247_v12 = vld [vmem:[%s215_s28 + $0x10] sm:$0xff]  ;;  %v233_v14 = vmul.f32 %v371_v0, %v225_v11 }
  0x10   : > { %v253_v7 = vmul.f32 %v373_v1, %v245_v4  ;;  %v254_v13 = vmul.f32 %v373_v1, %v246_v10  ;;  %v255_v15 = vmul.f32 %v373_v1, %v247_v12  ;;  %v226_v16 = vld [vmem:[%s209_s25 + $0x18] sm:$0xff]  ;;  %v227_v18 = vld [vmem:[%s209_s25 + $0x20] sm:$0xff]  ;;  %v228_v24 = vld [vmem:[%s209_s25 + $0x28] sm:$0xff] }
  0x11   : > { %v248_v17 = vld [vmem:[%s215_s28 + $0x18] sm:$0xff]  ;;  %v239_v19 = vadd.f32 %v372_v2, %v231_v6  ;;  %v240_v20 = vadd.f32 %v372_v2, %v232_v9  ;;  %v234_v21 = vmul.f32 %v371_v0, %v226_v16  ;;  %v249_v23 = vld [vmem:[%s215_s28 + $0x20] sm:$0xff]  ;;  %v250_v25 = vld [vmem:[%s215_s28 + $0x28] sm:$0xff]  ;;  %v241_v26 = vadd.f32 %v372_v2, %v233_v14 }
  0x12   : > { %v256_v22 = vmul.f32 %v373_v1, %v248_v17  ;;  %v235_v27 = vmul.f32 %v371_v0, %v227_v18  ;;  %v257_v28 = vmul.f32 %v373_v1, %v249_v23  ;;  %v236_v29 = vmul.f32 %v371_v0, %v228_v24 }
  0x13   : > { %v259_v30 = vadd.f32 %v253_v7, %v239_v19  ;;  %v260_v31 = vadd.f32 %v254_v13, %v240_v20  ;;  %v242_v32 = vadd.f32 %v372_v2, %v234_v21  ;;  %v258_v33 = vmul.f32 %v373_v1, %v250_v25 }
  0x14   : > { %v261_v34 = vadd.f32 %v255_v15, %v241_v26  ;;  %v243_v35 = vadd.f32 %v372_v2, %v235_v27  ;;  %v244_v36 = vadd.f32 %v372_v2, %v236_v29 }
  0x15   : > { %v267_v37 = vadd.f32 %v374_v8, %v259_v30  ;;  %v268_v38 = vadd.f32 %v374_v8, %v260_v31  ;;  %v262_v39 = vadd.f32 %v256_v22, %v242_v32 }
  0x16   : > { %v269_v40 = vadd.f32 %v374_v8, %v261_v34  ;;  %v263_v41 = vadd.f32 %v257_v28, %v243_v35  ;;  %v264_v42 = vadd.f32 %v258_v33, %v244_v36 }
  0x17   : > { %v273_v43 = vmax.f32 %v267_v37, 0.0  ;;  %v274_v44 = vmax.f32 %v268_v38, 0.0  ;;  %v270_v45 = vadd.f32 %v374_v8, %v262_v39 }
  0x18   : > { %v275_v46 = vmax.f32 %v269_v40, 0.0  ;;  %v271_v47 = vadd.f32 %v374_v8, %v263_v41  ;;  %v272_v48 = vadd.f32 %v374_v8, %v264_v42 }
  0x19   : > { %279 = vst [vmem:[%s221_s9] sm:$0xff] %v273_v43  ;;  %v276_v49 = vmax.f32 %v270_v45, 0.0 }
  0x1a   : > { %280 = vst [vmem:[%s221_s9 + $0x8] sm:$0xff] %v274_v44  ;;  %v277_v50 = vmax.f32 %v271_v47, 0.0  ;;  %v278_v51 = vmax.f32 %v272_v48, 0.0 }
  0x1b   : > { %281 = vst [vmem:[%s221_s9 + $0x10] sm:$0xff] %v275_v46 }
  0x1c   : > { %282 = vst [vmem:[%s221_s9 + $0x18] sm:$0xff] %v276_v49 }
  0x1d   : > { %283 = vst [vmem:[%s221_s9 + $0x20] sm:$0xff] %v277_v50 }
  0x1e   : > { %284 = vst [vmem:[%s221_s9 + $0x28] sm:$0xff] %v278_v51 }
  0x1f PF: > { %s14_s15 = sadd.s32 1, %s381_s15  }
  0x20   : > { %p11_p4 = scmp.ge.s32.totalorder %s14_s15, 5  }
  0x22   :  { %13 = sbr.rel (!%p11_p4) target bundleno = 1 (0x1), region = 69 }

// kernel: conv_block_forward.7
= control target key start
LH: loop header
LB: loop body
LE: loop exit
PB: predicated region body
PF: predicated region fallthrough
CT: control target
= control target key end

     0   :  { %s1898_s18 = smov 0   ;;  %s2233_s0 = inlined_call_operand.vmem [shape: bf16[144,1152], index: 0, kind: input, shape index: {}]   ;;  %s2234_s1 = inlined_call_operand.vmem [shape: bf16[1152,128], index: 1, kind: input, shape index: {}]   ;;  %s2235_s2 = inlined_call_operand.vmem [shape: f32[1,128], index: 2, kind: input, shape index: {}]   ;;  %s2236_s3 = inlined_call_operand.vmem [shape: f32[1,128], index: 3, kind: input, shape index: {}]   ;;  %s2237_s4 = inlined_call_operand.vmem [shape: f32[144,128], index: 4, kind: output, shape index: {0}]   ;;  %s2238_s5 = inlined_call_operand.vmem [shape: f32[2,128], index: 5, kind: output, shape index: {1}]  }
   0x1 LB: > { %s1904_s19 = sadd.s32 4294967295, %s1865_s18   ;;  %p1329_p0 = scmp.ge.s32.totalorder %s1865_s18, 1  ;;  %s1865_s18 = sphi %s1898_s18, %s16_s18  }
   0x2   : > { %p187_p1 = scmp.lt.s32.totalorder %s1865_s18, 4 }
   0x4   : > { %p188_p2 = pnand %p1329_p0, %p187_p1 }
   0x5   : > { %s216_s20 = smul.u32 (!%p188_p2), 6, %s1904_s19  ;;  %p1332_p4 = scmp.ne.s32.totalorder (!%p188_p2), %s1904_s19, 0 }
   0x6   : > { %191 = sbr.rel (%p188_p2) target bundleno = 363 (0x16b), region = 36 }
   0x7   : > { %p217_p3 = scmp.lt.s32.totalorder (!%p188_p2), %s216_s20, 17 }
   0xb   : > { %s2240_s20 = smov (!%p217_p3, %s216_s20), 17  ;;  %232 = sbr.rel (%p1332_p4) target bundleno = 18 (0x12), region = 40 }
   0xc   : > { %s1847_s21 = smul.u32 36, %s2240_s20  ;;  %s1331_s22 = sshll.u32 %s2240_s20, 3 }
   0xd   : > { %s1912_s25 = scalar_lea.vmem %s2237_s4, %s1331_s22 }
   0xe   : > { %s1917_s28 = scalar_lea.vmem %s2233_s0, %s1847_s21 }
  0x10   : > { %v1867_v0 = vmov 0.0  }
  0x11   : > { %233 = vst [vmem:[#allocation2] sm:$0x3] %v1867_v0 }
  0x12 PF: > { %v1766_v1 = vld [vmem:[%s2234_s1 + $0x38] sm:$0xff]  ;;  %v1765_v3 = vld [vmem:[%s2234_s1 + $0x30] sm:$0xff]  ;;  %v1764_v7 = vld [vmem:[%s2234_s1 + $0x28] sm:$0xff]  ;;  %p1729_p5 = scmp.ne.s32.totalorder %s1904_s19, 2 }
  0x13   : > { %v1782_v2 = vld [vmem:[%s2234_s1 + $0xb8] sm:$0xff]  ;;  %1831 = vmatpush.bf16.msra.mxu1 %v1766_v1  ;;  %978 = vmatpush.bf16.msra.mxu0 %v1766_v1  ;;  %v1781_v4 = vld [vmem:[%s2234_s1 + $0xb0] sm:$0xff]  ;;  %v1780_v8 = vld [vmem:[%s2234_s1 + $0xa8] sm:$0xff] }
  0x14   : > { %1026 = vmatpush.bf16.msra.mxu2 %v1782_v2  ;;  %v1790_v5 = vld [vmem:[%s2234_s1 + $0xf8] sm:$0xff]  ;;  %v1789_v6 = vld [vmem:[%s2234_s1 + $0xf0] sm:$0xff]  ;;  %v1788_v9 = vld [vmem:[%s2234_s1 + $0xe8] sm:$0xff] }
  0x15   : > { %1050 = vmatpush.bf16.msra.mxu3 %v1790_v5  ;;  %v1763_v10 = vld [vmem:[%s2234_s1 + $0x20] sm:$0xff]  ;;  %v1762_v13 = vld [vmem:[%s2234_s1 + $0x18] sm:$0xff]  ;;  %v1761_v16 = vld [vmem:[%s2234_s1 + $0x10] sm:$0xff] }
  0x16   : > { %v1779_v11 = vld [vmem:[%s2234_s1 + $0xa0] sm:$0xff]  ;;  %v1778_v14 = vld [vmem:[%s2234_s1 + $0x98] sm:$0xff]  ;;  %v1777_v17 = vld [vmem:[%s2234_s1 + $0x90] sm:$0xff] }
  0x17   : > { %1832 = vmatpush.bf16.msra.mxu1 %v1765_v3  ;;  %979 = vmatpush.bf16.msra.mxu0 %v1765_v3  ;;  %v1787_v12 = vld [vmem:[%s2234_s1 + $0xe0] sm:$0xff]  ;;  %v1786_v15 = vld [vmem:[%s2234_s1 + $0xd8] sm:$0xff]  ;;  %v1785_v18 = vld [vmem:[%s2234_s1 + $0xd0] sm:$0xff] }
  0x18   : > { %1027 = vmatpush.bf16.msra.mxu2 %v1781_v4  ;;  %v1760_v19 = vld [vmem:[%s2234_s1 + $0x8] sm:$0xff]  ;;  %v1759_v21 = vld [vmem:[%s2234_s1] sm:$0xff]  ;;  %v1774_v22 = vld [vmem:[%s2234_s1 + $0x78] sm:$0xff] }
  0x19   : > { %1051 = vmatpush.bf16.msra.mxu3 %v1789_v6  ;;  %v1776_v20 = vld [vmem:[%s2234_s1 + $0x88] sm:$0xff]  ;;  %v1335_v23 = vld [vmem:[%s1917_s28] sm:$0xf]  ;;  %v1736_v25 = vld [vmem:[%s1917_s28 + $0x20] sm:$0xf0] }
  0x1a   : > { %v1784_v24 = vld [vmem:[%s2234_s1 + $0xc8] sm:$0xff]  ;;  %v1407_v26 = vld [vmem:[%s1917_s28 + $0x90] sm:$0xf]  ;;  %v1754_v27 = vld [vmem:[%s1917_s28 + $0xb0] sm:$0xf0]  ;;  %v1336_v33 = vor.u32 %v1736_v25, %v1335_v23 }
  0x1b   : > { %1833 = vmatpush.bf16.msra.mxu1 %v1764_v7  ;;  %980 = vmatpush.bf16.msra.mxu0 %v1764_v7  ;;  %v1775_v28 = vld [vmem:[%s2234_s1 + $0x80] sm:$0xff]  ;;  %v1343_v29 = vld [vmem:[%s1917_s28 + $0x8] sm:$0xf]  ;;  %v1737_v30 = vld [vmem:[%s1917_s28 + $0x28] sm:$0xf0]  ;;  %v1408_v34 = vor.u32 %v1754_v27, %v1407_v26 }
  0x1c   : > { %1028 = vmatpush.bf16.msra.mxu2 %v1780_v8  ;;  %v1798_v31 = vld [vmem:[%s2234_s1 + $0x138] sm:$0xff]  ;;  %v1344_v35 = vor.u32 %v1737_v30, %v1343_v29  ;;  %v1783_v36 = vld [vmem:[%s2234_s1 + $0xc0] sm:$0xff]  ;;  %v1733_v37 = vld [vmem:[%s1917_s28 + $0xc] sm:$0xf] }
  0x1d   : > { %1052 = vmatpush.bf16.msra.mxu3 %v1788_v9  ;;  %v1814_v32 = vld [vmem:[%s2234_s1 + $0x1b8] sm:$0xff]  ;;  %v1345_v38 = vld [vmem:[%s1917_s28 + $0x2c] sm:$0xf0]  ;;  %v1772_v44 = vld [vmem:[%s2234_s1 + $0x68] sm:$0xff] }
  0x1e   : > { %v1773_v39 = vld [vmem:[%s2234_s1 + $0x70] sm:$0xff]  ;;  %v1822_v40 = vld [vmem:[%s2234_s1 + $0x1f8] sm:$0xff]  ;;  %v1348_v43 = vor.u32 %v1733_v37, %v1345_v38  ;;  %v1796_v46 = vld [vmem:[%s2234_s1 + $0x128] sm:$0xff] }
  0x1f   : > { %1834 = vmatpush.bf16.msra.mxu1 %v1763_v10  ;;  %981 = vmatpush.bf16.msra.mxu0 %v1763_v10  ;;  %v1797_v41 = vld [vmem:[%s2234_s1 + $0x130] sm:$0xff]  ;;  %v1812_v47 = vld [vmem:[%s2234_s1 + $0x1a8] sm:$0xff]  ;;  %v1771_v48 = vld [vmem:[%s2234_s1 + $0x60] sm:$0xff] }
  0x20   : > { %1029 = vmatpush.bf16.msra.mxu2 %v1779_v11  ;;  %v1813_v42 = vld [vmem:[%s2234_s1 + $0x1b0] sm:$0xff]  ;;  %v1820_v49 = vld [vmem:[%s2234_s1 + $0x1e8] sm:$0xff]  ;;  %v1795_v50 = vld [vmem:[%s2234_s1 + $0x120] sm:$0xff] }
  0x21   : > { %1053 = vmatpush.bf16.msra.mxu3 %v1787_v12  ;;  %v1821_v45 = vld [vmem:[%s2234_s1 + $0x1f0] sm:$0xff]  ;;  %v1811_v51 = vld [vmem:[%s2234_s1 + $0x1a0] sm:$0xff]  ;;  %v1371_v52 = vld [vmem:[%s1917_s28 + $0x48] sm:$0xf] }
  0x22   : > { %v1745_v53 = vld [vmem:[%s1917_s28 + $0x68] sm:$0xf0]  ;;  %v1770_v54 = vld [vmem:[%s2234_s1 + $0x58] sm:$0xff]  ;;  %v1379_v55 = vld [vmem:[%s1917_s28 + $0x50] sm:$0xf] }
  0x23   : > { %1835 = vmatpush.bf16.msra.mxu1 %v1762_v13  ;;  %982 = vmatpush.bf16.msra.mxu0 %v1762_v13  ;;  %v1746_v56 = vld [vmem:[%s1917_s28 + $0x70] sm:$0xf0]  ;;  %v1794_v57 = vld [vmem:[%s2234_s1 + $0x118] sm:$0xff]  ;;  %v1372_v59 = vor.u32 %v1745_v53, %v1371_v52  ;;  %v1819_v63 = vld [vmem:[%s2234_s1 + $0x1e0] sm:$0xff] }
  0x24   : > { %1030 = vmatpush.bf16.msra.mxu2 %v1778_v14  ;;  %v1810_v58 = vld [vmem:[%s2234_s1 + $0x198] sm:$0xff]  ;;  %v1380_v60 = vor.u32 %v1746_v56, %v1379_v55  ;;  %v1742_v61 = vld [vmem:[%s1917_s28 + $0x54] sm:$0xf]  ;;  %v1768_v5 = vld [vmem:[%s2234_s1 + $0x48] sm:$0xff] }
  0x25   : > { %1054 = vmatpush.bf16.msra.mxu3 %v1786_v15  ;;  %v1381_v62 = vld [vmem:[%s1917_s28 + $0x74] sm:$0xf0]  ;;  %v1769_v0 = vld [vmem:[%s2234_s1 + $0x50] sm:$0xff]  ;;  %v1792_v6 = vld [vmem:[%s2234_s1 + $0x108] sm:$0xff] }
  0x26   : > { %v1793_v1 = vld [vmem:[%s2234_s1 + $0x110] sm:$0xff]  ;;  %v1384_v3 = vor.u32 %v1742_v61, %v1381_v62  ;;  %v1818_v4 = vld [vmem:[%s2234_s1 + $0x1d8] sm:$0xff]  ;;  %v1808_v7 = vld [vmem:[%s2234_s1 + $0x188] sm:$0xff] }
  0x27   : > { %1836 = vmatpush.bf16.msra.mxu1 %v1761_v16  ;;  %983 = vmatpush.bf16.msra.mxu0 %v1761_v16  ;;  %v1809_v2 = vld [vmem:[%s2234_s1 + $0x190] sm:$0xff]  ;;  %v1767_v9 = vld [vmem:[%s2234_s1 + $0x40] sm:$0xff]  ;;  %v1337_v11 = vld [vmem:[%s1917_s28 + $0x24] sm:$0xf0] }
  0x28   : > { %1031 = vmatpush.bf16.msra.mxu2 %v1777_v17  ;;  %v1817_v8 = vld [vmem:[%s2234_s1 + $0x1d0] sm:$0xff]  ;;  %v1732_v10 = vld [vmem:[%s1917_s28 + $0x4] sm:$0xf]  ;;  %v1806_v12 = vld [vmem:[%s2234_s1 + $0x178] sm:$0xff] }
  0x29   : > { %1055 = vmatpush.bf16.msra.mxu3 %v1785_v18  ;;  %v1791_v13 = vld [vmem:[%s2234_s1 + $0x100] sm:$0xff]  ;;  %v1830_v14 = vld [vmem:[%s2234_s1 + $0x238] sm:$0xff]  ;;  %v1340_v16 = vor.u32 %v1732_v10, %v1337_v11  ;;  %v1351_v17 = vld [vmem:[%s1917_s28 + $0x10] sm:$0xf] }
  0x2a   : > { %v1807_v15 = vld [vmem:[%s2234_s1 + $0x180] sm:$0xff]  ;;  %v1738_v18 = vld [vmem:[%s1917_s28 + $0x30] sm:$0xf0]  ;;  %v1751_v25 = vld [vmem:[%s1917_s28 + $0x9c] sm:$0xf] }
  0x2b   : > { %1837 = vmatpush.bf16.msra.mxu1 %v1760_v19  ;;  %984 = vmatpush.bf16.msra.mxu0 %v1760_v19  ;;  %v1816_v19 = vld [vmem:[%s2234_s1 + $0x1c8] sm:$0xff]  ;;  %v1352_v23 = vor.u32 %v1738_v18, %v1351_v17  ;;  %v1417_v26 = vld [vmem:[%s1917_s28 + $0xbc] sm:$0xf0]  ;;  %v1829_v27 = vld [vmem:[%s2234_s1 + $0x230] sm:$0xff] }
  0x2c   : > { %1032 = vmatpush.bf16.msra.mxu2 %v1776_v20  ;;  %v1415_v20 = vld [vmem:[%s1917_s28 + $0x98] sm:$0xf]  ;;  %v1804_v29 = vld [vmem:[%s2234_s1 + $0x168] sm:$0xff]  ;;  %v1420_v30 = vor.u32 %v1751_v25, %v1417_v26  ;;  %v1799_v52 = vld [vmem:[%s2234_s1 + $0x140] sm:$0xff] }
  0x2d   : > { %1056 = vmatpush.bf16.msra.mxu3 %v1784_v24  ;;  %v1387_v38 = vld [vmem:[%s1917_s28 + $0x58] sm:$0xf]  ;;  %v1823_v53 = vld [vmem:[%s2234_s1 + $0x200] sm:$0xff]  ;;  %v1753_v11 = vld [vmem:[%s1917_s28 + $0xac] sm:$0xf] }
  0x2e   : > { %v1409_v55 = vld [vmem:[%s1917_s28 + $0xb4] sm:$0xf0]  ;;  %v1403_v17 = vld [vmem:[%s1917_s28 + $0x68] sm:$0xf]  ;;  %v1749_v18 = vld [vmem:[%s1917_s28 + $0x88] sm:$0xf0] }
  0x2f   : > { %1838 = vmatpush.bf16.msra.mxu1 %v1759_v21  ;;  %985 = vmatpush.bf16.msra.mxu0 %v1759_v21  ;;  %v1755_v21 = vld [vmem:[%s1917_s28 + $0xb8] sm:$0xf0] }
  0x30   : > { %1033 = vmatpush.bf16.msra.mxu2 %v1775_v28  ;;  %v1416_v24 = vor.u32 %v1755_v21, %v1415_v20  ;;  %v1815_v28 = vld [vmem:[%s2234_s1 + $0x1c0] sm:$0xff]  ;;  %v1758_v20 = vld [vmem:[%s1917_s28 + $0xd0] sm:$0xf0]  ;;  %v1404_v21 = vor.u32 %v1749_v18, %v1403_v17 }
  0x31   : > { %1057 = vmatpush.bf16.msra.mxu3 %v1783_v36  ;;  %v1802_v36 = vld [vmem:[%s2234_s1 + $0x158] sm:$0xff] }
  0x32   : > { %986 = vmatmul.bf16.vlgmr.msra.gmra.mxu0 %v1336_v33  ;;  %996 = vmatmul.bf16.vlgmr.msra.gmra.mxu1 %v1408_v34  ;;  %v1827_v33 = vld [vmem:[%s2234_s1 + $0x220] sm:$0xff]  ;;  %v1741_v34 = vld [vmem:[%s1917_s28 + $0x4c] sm:$0xf] }
  0x33   : > { %1002 = vmatpush.bf16.msrb.mxu1 %v1774_v22  ;;  %1074 = vmatpush.bf16.msrb.mxu0 %v1798_v31  ;;  %v1805_v22 = vld [vmem:[%s2234_s1 + $0x170] sm:$0xff]  ;;  %v1828_v31 = vld [vmem:[%s2234_s1 + $0x228] sm:$0xff] }
  0x34   : > { %1122 = vmatpush.bf16.msrb.mxu2 %v1814_v32  ;;  %1058 = vmatmul.bf16.vlgmr.msra.gmra.mxu3 %v1348_v43  ;;  %v1803_v32 = vld [vmem:[%s2234_s1 + $0x160] sm:$0xff]  ;;  %v1801_v43 = vld [vmem:[%s2234_s1 + $0x150] sm:$0xff] }
  0x35   : > { %1034 = vmatmul.bf16.vlgmr.msra.gmra.mxu2 %v1344_v35  ;;  %1146 = vmatpush.bf16.msrb.mxu3 %v1822_v40  ;;  %v1373_v35 = vld [vmem:[%s1917_s28 + $0x6c] sm:$0xf0]  ;;  %v1826_v40 = vld [vmem:[%s2234_s1 + $0x218] sm:$0xff] }
  0x36   : > { %v1376_v37 = vor.u32 %v1741_v34, %v1373_v35 }
  0x37   : > { %1003 = vmatpush.bf16.msrb.mxu1 %v1773_v39  ;;  %1075 = vmatpush.bf16.msrb.mxu0 %v1797_v41  ;;  %v1747_v39 = vld [vmem:[%s1917_s28 + $0x78] sm:$0xf0]  ;;  %v1359_v41 = vld [vmem:[%s1917_s28 + $0x18] sm:$0xf] }
  0x38   : > { %1123 = vmatpush.bf16.msrb.mxu2 %v1813_v42  ;;  %v1739_v42 = vld [vmem:[%s1917_s28 + $0x38] sm:$0xf0] }
  0x39   : > { %1147 = vmatpush.bf16.msrb.mxu3 %v1821_v45  ;;  %v1360_v45 = vor.u32 %v1739_v42, %v1359_v41 }
  0x3b   : > { %1004 = vmatpush.bf16.msrb.mxu1 %v1772_v44  ;;  %1076 = vmatpush.bf16.msrb.mxu0 %v1796_v46  ;;  %v1388_v44 = vor.u32 %v1747_v39, %v1387_v38  ;;  %v1735_v46 = vld [vmem:[%s1917_s28 + $0x1c] sm:$0xf] }
  0x3c   : > { %1124 = vmatpush.bf16.msrb.mxu2 %v1812_v47  ;;  %v1361_v47 = vld [vmem:[%s1917_s28 + $0x3c] sm:$0xf0] }
  0x3d   : > { %1148 = vmatpush.bf16.msrb.mxu3 %v1820_v49  ;;  %v1800_v49 = vld [vmem:[%s2234_s1 + $0x148] sm:$0xff] }
  0x3f   : > { %1005 = vmatpush.bf16.msrb.mxu1 %v1771_v48  ;;  %1077 = vmatpush.bf16.msrb.mxu0 %v1795_v50  ;;  %v1825_v48 = vld [vmem:[%s2234_s1 + $0x210] sm:$0xff]  ;;  %v1364_v50 = vor.u32 %v1735_v46, %v1361_v47 }
  0x40   : > { %1125 = vmatpush.bf16.msrb.mxu2 %v1811_v51  ;;  %v1824_v51 = vld [vmem:[%s2234_s1 + $0x208] sm:$0xff] }
  0x41   : > { %1149 = vmatpush.bf16.msrb.mxu3 %v1819_v63  ;;  %v1744_v63 = vld [vmem:[%s1917_s28 + $0x64] sm:$0xf] }
  0x42   : > { %991 = vmatmul.bf16.gmra.mxu0 %v1372_v59  ;;  %v1395_v59 = vld [vmem:[%s1917_s28 + $0x60] sm:$0xf] }
  0x43   : > { %1006 = vmatpush.bf16.msrb.mxu1 %v1770_v54  ;;  %1078 = vmatpush.bf16.msrb.mxu0 %v1794_v57  ;;  %v1750_v54 = vld [vmem:[%s1917_s28 + $0x94] sm:$0xf]  ;;  %v1423_v57 = vld [vmem:[%s1917_s28 + $0xa0] sm:$0xf] }
  0x44   : > { %1126 = vmatpush.bf16.msrb.mxu2 %v1810_v58  ;;  %1063 = vmatmul.bf16.gmra.mxu3 %v1384_v3  ;;  %v1412_v56 = vor.u32 %v1750_v54, %v1409_v55  ;;  %v1756_v58 = vld [vmem:[%s1917_s28 + $0xc0] sm:$0xf0]  ;;  %v1353_v3 = vld [vmem:[%s1917_s28 + $0x34] sm:$0xf0] }
  0x45   : > { %1039 = vmatmul.bf16.gmra.mxu2 %v1380_v60  ;;  %1150 = vmatpush.bf16.msrb.mxu3 %v1818_v4  ;;  %v1748_v60 = vld [vmem:[%s1917_s28 + $0x80] sm:$0xf0]  ;;  %v1424_v61 = vor.u32 %v1756_v58, %v1423_v57 }
  0x46   : > { %v1396_v62 = vor.u32 %v1748_v60, %v1395_v59 }
  0x47   : > { %1007 = vmatpush.bf16.msrb.mxu1 %v1769_v0  ;;  %1079 = vmatpush.bf16.msrb.mxu0 %v1793_v1  ;;  %v1397_v0 = vld [vmem:[%s1917_s28 + $0x84] sm:$0xf0] }
  0x48   : > { %1127 = vmatpush.bf16.msrb.mxu2 %v1809_v2  ;;  %v1400_v1 = vor.u32 %v1744_v63, %v1397_v0  ;;  %v1734_v2 = vld [vmem:[%s1917_s28 + $0x14] sm:$0xf] }
  0x49   : > { %1151 = vmatpush.bf16.msrb.mxu3 %v1817_v8  ;;  %v1356_v4 = vor.u32 %v1734_v2, %v1353_v3  ;;  %v1757_v8 = vld [vmem:[%s1917_s28 + $0xc8] sm:$0xf0] }
  0x4b   : > { %1008 = vmatpush.bf16.msrb.mxu1 %v1768_v5  ;;  %1080 = vmatpush.bf16.msrb.mxu0 %v1792_v6  ;;  %v1367_v5 = vld [vmem:[%s1917_s28 + $0x20] sm:$0xf]  ;;  %v1740_v6 = vld [vmem:[%s1917_s28 + $0x40] sm:$0xf0] }
  0x4c   : > { %1128 = vmatpush.bf16.msrb.mxu2 %v1808_v7  ;;  %v1431_v7 = vld [vmem:[%s1917_s28 + $0xa8] sm:$0xf] }
  0x4d   : > { %1152 = vmatpush.bf16.msrb.mxu3 %v1816_v19  ;;  %v1432_v10 = vor.u32 %v1757_v8, %v1431_v7  ;;  %v1439_v19 = vld [vmem:[%s1917_s28 + $0xb0] sm:$0xf] }
  0x4f   : > { %1009 = vmatpush.bf16.msrb.mxu1 %v1767_v9  ;;  %1081 = vmatpush.bf16.msrb.mxu0 %v1791_v13  ;;  %v1368_v9 = vor.u32 %v1740_v6, %v1367_v5 }
  0x50   : > { %1129 = vmatpush.bf16.msrb.mxu2 %v1807_v15  ;;  %v1389_v15 = vld [vmem:[%s1917_s28 + $0x7c] sm:$0xf0] }
  0x51   : > { %1153 = vmatpush.bf16.msrb.mxu3 %v1815_v28 }
  0x52   : > { %1010 = vmatmul.bf16.vlgmr.msrb.gmra.mxu1 %v1340_v16  ;;  %1082 = vmatmul.bf16.vlgmr.msrb.gmra.mxu0 %v1352_v23  ;;  %v1752_v23 = vld [vmem:[%s1917_s28 + $0xa4] sm:$0xf] }
  0x53   : > { %1098 = vmatpush.bf16.msra.mxu1 %v1806_v12  ;;  %1170 = vmatpush.bf16.msra.mxu0 %v1830_v14  ;;  %v1433_v12 = vld [vmem:[%s1917_s28 + $0xcc] sm:$0xf0] }
  0x54   : > { %1839 = vmatpush.bf16.msra.mxu2 %v1830_v14  ;;  %1068 = vmatmul.bf16.gmra.mxu3 %v1420_v30  ;;  %v1436_v13 = vor.u32 %v1753_v11, %v1433_v12  ;;  %v1743_v14 = vld [vmem:[%s1917_s28 + $0x5c] sm:$0xf] }
  0x55   : > { %1044 = vmatmul.bf16.gmra.mxu2 %v1416_v24  ;;  %v1392_v16 = vor.u32 %v1743_v14, %v1389_v15  ;;  %v1425_v24 = vld [vmem:[%s1917_s28 + $0xc4] sm:$0xf0] }
  0x56   : > { %v1428_v25 = vor.u32 %v1752_v23, %v1425_v24 }
  0x57   : > { %1099 = vmatpush.bf16.msra.mxu1 %v1805_v22  ;;  %1171 = vmatpush.bf16.msra.mxu0 %v1829_v27  ;;  %v1440_v22 = vor.u32 %v1758_v20, %v1439_v19 }
  0x58   : > { %1840 = vmatpush.bf16.msra.mxu2 %v1829_v27 }
  0x5b   : > { %1100 = vmatpush.bf16.msra.mxu1 %v1804_v29  ;;  %1172 = vmatpush.bf16.msra.mxu0 %v1828_v31 }
  0x5c   : > { %1841 = vmatpush.bf16.msra.mxu2 %v1828_v31 }
  0x5f   : > { %1101 = vmatpush.bf16.msra.mxu1 %v1803_v32  ;;  %1173 = vmatpush.bf16.msra.mxu0 %v1827_v33 }
  0x60   : > { %1842 = vmatpush.bf16.msra.mxu2 %v1827_v33 }
  0x62   : > { %1015 = vmatmul.bf16.gmra.mxu1 %v1376_v37  ;;  %1087 = vmatmul.bf16.gmra.mxu0 %v1388_v44 }
  0x63   : > { %1102 = vmatpush.bf16.msra.mxu1 %v1802_v36  ;;  %1174 = vmatpush.bf16.msra.mxu0 %v1826_v40 }
  0x64   : > { %1843 = vmatpush.bf16.msra.mxu2 %v1826_v40  ;;  %1154 = vmatmul.bf16.vlgmr.msrb.gmra.mxu3 %v1364_v50 }
  0x65   : > { %1130 = vmatmul.bf16.vlgmr.msrb.gmra.mxu2 %v1360_v45 }
  0x67   : > { %1103 = vmatpush.bf16.msra.mxu1 %v1801_v43  ;;  %1175 = vmatpush.bf16.msra.mxu0 %v1825_v48 }
  0x68   : > { %1844 = vmatpush.bf16.msra.mxu2 %v1825_v48 }
  0x6b   : > { %1104 = vmatpush.bf16.msra.mxu1 %v1800_v49  ;;  %1176 = vmatpush.bf16.msra.mxu0 %v1824_v51 }
  0x6c   : > { %1845 = vmatpush.bf16.msra.mxu2 %v1824_v51 }
  0x6f   : > { %1105 = vmatpush.bf16.msra.mxu1 %v1799_v52  ;;  %1177 = vmatpush.bf16.msra.mxu0 %v1823_v53 }
  0x70   : > { %1846 = vmatpush.bf16.msra.mxu2 %v1823_v53 }
  0x72   : > { %1020 = vmatmul.bf16.gmra.mxu1 %v1412_v56  ;;  %1092 = vmatmul.bf16.gmra.mxu0 %v1424_v61 }
  0x74   : > { %1159 = vmatmul.bf16.gmra.mxu3 %v1400_v1 }
  0x75   : > { %1135 = vmatmul.bf16.gmra.mxu2 %v1396_v62 }
  0x82   : > { %1106 = vmatmul.bf16.vlgmr.msra.gmra.mxu1 %v1356_v4  ;;  %1178 = vmatmul.bf16.vlgmr.msra.gmra.mxu0 %v1368_v9 }
  0x84   : > { %1164 = vmatmul.bf16.gmra.mxu3 %v1436_v13 }
  0x85   : > { %1140 = vmatmul.bf16.gmra.mxu2 %v1432_v10 }
  0x92   : > { %1111 = vmatmul.bf16.gmra.mxu1 %v1392_v16  ;;  %1183 = vmatmul.bf16.gmra.mxu0 %v1404_v21 }
  0x95   : > { %1188 = vmatmul.bf16.vlgmr.msra.gmra.mxu2 %v1440_v22 }
  0xa2   : > { %1116 = vmatmul.bf16.gmra.mxu1 %v1428_v25 }
  0xaf   : > { %v987_v26 = vpop.f32.mrf.mxu0  ;;  %v2190_v29 = vpop.f32.mrf.mxu1 }
  0xb7   : > { %v989_v28 = vpop.f32.mrf.mxu0  ;;  %v1059_v30 = vpop.f32.mrf.mxu3 }
  0xb8   : > { %v1035_v27 = vpop.f32.mrf.mxu2  ;;  %v2192_v33 = vpop.f32.mrf.mxu1 }
  0xbf   : > { %v992_v32 = vpop.f32.mrf.mxu0  ;;  %v1061_v34 = vpop.f32.mrf.mxu3 }
  0xc0   : > { %v1037_v31 = vpop.f32.mrf.mxu2 }
  0xc7   : > { %v994_v36 = vpop.f32.mrf.mxu0  ;;  %v1064_v39 = vpop.f32.mrf.mxu3 }
  0xc8   : > { %v1040_v35 = vpop.f32.mrf.mxu2 }
  0xcf   : > { %v1011_v37 = vpop.f32.mrf.mxu1  ;;  %v1083_v40 = vpop.f32.mrf.mxu0 }
  0xd0   : > { %v1042_v38 = vpop.f32.mrf.mxu2  ;;  %v1066_v44 = vpop.f32.mrf.mxu3  ;;  %v1012_v55 = vadd.f32 %v1011_v37, %v987_v26 }
  0xd2   : > { %v1036_v57 = vadd.f32 %v1035_v27, %v1012_v55 }
  0xd4   : > { %v1060_v60 = vadd.f32 %v1059_v30, %v1036_v57 }
  0xd6   : > { %v1084_v0 = vadd.f32 %v1083_v40, %v1060_v60 }
  0xd7   : > { %v1013_v41 = vpop.f32.mrf.mxu1  ;;  %v1085_v43 = vpop.f32.mrf.mxu0 }
  0xd8   : > { %v1045_v42 = vpop.f32.mrf.mxu2  ;;  %v2196_v48 = vpop.f32.mrf.mxu3  ;;  %v1014_v61 = vadd.f32 %v1013_v41, %v989_v28 }
  0xda   : > { %v1038_v1 = vadd.f32 %v1037_v31, %v1014_v61 }
  0xdc   : > { %v1062_v4 = vadd.f32 %v1061_v34, %v1038_v1 }
  0xde   : > { %v1086_v11 = vadd.f32 %v1085_v43, %v1062_v4 }
  0xdf   : > { %v1016_v45 = vpop.f32.mrf.mxu1  ;;  %v1088_v47 = vpop.f32.mrf.mxu0 }
  0xe0   : > { %v2194_v46 = vpop.f32.mrf.mxu2  ;;  %v2198_v53 = vpop.f32.mrf.mxu3  ;;  %v1017_v5 = vadd.f32 %v1016_v45, %v992_v32 }
  0xe2   : > { %v1041_v12 = vadd.f32 %v1040_v35, %v1017_v5 }
  0xe4   : > { %v1065_v16 = vadd.f32 %v1064_v39, %v1041_v12 }
  0xe6   : > { %v1089_v22 = vadd.f32 %v1088_v47, %v1065_v16 }
  0xe7   : > { %v1018_v49 = vpop.f32.mrf.mxu1  ;;  %v1090_v51 = vpop.f32.mrf.mxu0 }
  0xe8   : > { %v1131_v50 = vpop.f32.mrf.mxu2  ;;  %v1155_v59 = vpop.f32.mrf.mxu3  ;;  %v1019_v17 = vadd.f32 %v1018_v49, %v994_v36 }
  0xea   : > { %v1043_v23 = vadd.f32 %v1042_v38, %v1019_v17 }
  0xec   : > { %v1067_v32 = vadd.f32 %v1066_v44, %v1043_v23 }
  0xee   : > { %v1091_v40 = vadd.f32 %v1090_v51, %v1067_v32 }
  0xef   : > { %v1021_v52 = vpop.f32.mrf.mxu1  ;;  %v2200_v56 = vpop.f32.mrf.mxu0 }
  0xf0   : > { %v1133_v54 = vpop.f32.mrf.mxu2  ;;  %v1157_v8 = vpop.f32.mrf.mxu3  ;;  %v1022_v34 = vadd.f32 %v1021_v52, %v2190_v29 }
  0xf2   : > { %v1046_v41 = vadd.f32 %v1045_v42, %v1022_v34 }
  0xf4   : > { %v1070_v55 = vadd.f32 %v2196_v48, %v1046_v41 }
  0xf6   : > { %v1094_v51 = vadd.f32 %v2200_v56, %v1070_v55 }
  0xf7   : > { %v1023_v58 = vpop.f32.mrf.mxu1  ;;  %v2202_v62 = vpop.f32.mrf.mxu0 }
  0xf8   : > { %v1136_v63 = vpop.f32.mrf.mxu2  ;;  %v1160_v21 = vpop.f32.mrf.mxu3  ;;  %v1024_v44 = vadd.f32 %v1023_v58, %v2192_v33 }
  0xfa   : > { %v1048_v42 = vadd.f32 %v2194_v46, %v1024_v44 }
  0xfc   : > { %v1072_v48 = vadd.f32 %v2198_v53, %v1048_v42 }
  0xfe   : > { %v1096_v5 = vadd.f32 %v2202_v62, %v1072_v48 }
  0xff   : > { %v1107_v2 = vpop.f32.mrf.mxu1  ;;  %v1179_v7 = vpop.f32.mrf.mxu0 }
 0x100   : > { %v1108_v3 = vadd.f32 %v1107_v2, %v1084_v0  ;;  %v1138_v10 = vpop.f32.mrf.mxu2  ;;  %v1162_v38 = vpop.f32.mrf.mxu3 }
 0x102   : > { %v1132_v6 = vadd.f32 %v1131_v50, %v1108_v3 }
 0x104   : > { %v1156_v9 = vadd.f32 %v1155_v59, %v1132_v6 }
 0x106   : > { %v1180_v13 = vadd.f32 %v1179_v7, %v1156_v9 }
 0x107   : > { %v1109_v14 = vpop.f32.mrf.mxu1  ;;  %v1181_v19 = vpop.f32.mrf.mxu0 }
 0x108   : > { %1194 = vst [vmem:[%s1912_s25] sm:$0xff] %v1180_v13  ;;  %v1110_v15 = vadd.f32 %v1109_v14, %v1086_v11  ;;  %v1141_v25 = vpop.f32.mrf.mxu2  ;;  %v1215_v27 = vmul.f32 %v1180_v13, %v1180_v13  ;;  %v1165_v2 = vpop.f32.mrf.mxu3 }
 0x10a   : > { %v1134_v18 = vadd.f32 %v1133_v54, %v1110_v15 }
 0x10c   : > { %v1158_v20 = vadd.f32 %v1157_v8, %v1134_v18 }
 0x10e   : > { %v1182_v24 = vadd.f32 %v1181_v19, %v1158_v20 }
 0x10f   : > { %v1112_v26 = vpop.f32.mrf.mxu1  ;;  %v1184_v37 = vpop.f32.mrf.mxu0 }
 0x110   : > { %1195 = vst [vmem:[%s1912_s25 + $0x8] sm:$0xff] %v1182_v24  ;;  %v1201_v28 = vadd.f32 %v1182_v24, %v1180_v13  ;;  %v1216_v30 = vmul.f32 %v1182_v24, %v1182_v24  ;;  %v1113_v31 = vadd.f32 %v1112_v26, %v1089_v22  ;;  %v1143_v54 = vpop.f32.mrf.mxu2  ;;  %v1167_v11 = vpop.f32.mrf.mxu3 }
 0x112   : > { %v1221_v35 = vadd.f32 %v1216_v30, %v1215_v27  ;;  %v1137_v36 = vadd.f32 %v1136_v63, %v1113_v31 }
 0x114   : > { %v1161_v39 = vadd.f32 %v1160_v21, %v1137_v36 }
 0x116   : > { %v1185_v43 = vadd.f32 %v1184_v37, %v1161_v39 }
 0x117   : > { %v1114_v45 = vpop.f32.mrf.mxu1  ;;  %v1186_v57 = vpop.f32.mrf.mxu0 }
 0x118   : > { %1196 = vst [vmem:[%s1912_s25 + $0x10] sm:$0xff] %v1185_v43  ;;  %v1202_v47 = vadd.f32 %v1201_v28, %v1185_v43  ;;  %v1217_v49 = vmul.f32 %v1185_v43, %v1185_v43  ;;  %v1115_v50 = vadd.f32 %v1114_v45, %v1091_v40  ;;  %v1189_v58 = vpop.f32.mrf.mxu2  ;;  %v1214_v28 = vld [vmem:[#allocation2 + $0x1] sm:$0x1] }
 0x11a   : > { %v1222_v29 = vadd.f32 %v1221_v35, %v1217_v49  ;;  %v1139_v52 = vadd.f32 %v1138_v10, %v1115_v50 }
 0x11c   : > { %v1163_v59 = vadd.f32 %v1162_v38, %v1139_v52 }
 0x11e   : > { %v1187_v60 = vadd.f32 %v1186_v57, %v1163_v59 }
 0x11f   : > { %v1117_v61 = vpop.f32.mrf.mxu1 }
 0x120   : > { %1197 = vst [vmem:[%s1912_s25 + $0x18] sm:$0xff] %v1187_v60  ;;  %v1203_v63 = vadd.f32 %v1202_v47, %v1187_v60  ;;  %v1218_v0 = vmul.f32 %v1187_v60, %v1187_v60  ;;  %v1118_v1 = vadd.f32 %v1117_v61, %v1094_v51  ;;  %v1191_v13 = vpop.f32.mrf.mxu2 }
 0x122   : > { %v1223_v3 = vadd.f32 %v1222_v29, %v1218_v0  ;;  %v1142_v33 = vadd.f32 %v1141_v25, %v1118_v1  ;;  %v1200_v25 = vld [vmem:[#allocation2] sm:$0x1] }
 0x124   : > { %v1166_v4 = vadd.f32 %v1165_v2, %v1142_v33 }
 0x126   : > { %v1190_v56 = vadd.f32 %v1189_v58, %v1166_v4 }
 0x127   : > { %v1119_v6 = vpop.f32.mrf.mxu1 }
 0x128   : > { %1198 = vst [vmem:[%s1912_s25 + $0x20] sm:$0xff] %v1190_v56  ;;  %v1204_v46 = vadd.f32 %v1203_v63, %v1190_v56  ;;  %v1219_v7 = vmul.f32 %v1190_v56, %v1190_v56  ;;  %v1120_v8 = vadd.f32 %v1119_v6, %v1096_v5 }
 0x12a   : > { %v1224_v9 = vadd.f32 %v1223_v3, %v1219_v7  ;;  %v1144_v10 = vadd.f32 %v1143_v54, %v1120_v8 }
 0x12c   : > { %v1168_v12 = vadd.f32 %v1167_v11, %v1144_v10 }
 0x12e   : > { %v1192_v14 = vadd.f32 %v1191_v13, %v1168_v12 }
 0x130   : > { %1199 = vst [vmem:[%s1912_s25 + $0x28] sm:$0xff] %v1192_v14  ;;  %v1205_v53 = vadd.f32 %v1204_v46, %v1192_v14  ;;  %v1220_v15 = vmul.f32 %v1192_v14, %v1192_v14 }
 0x132   : > { %v1206_v16 = vrot.slane %v1205_v53, 4  ;;  %v1225_v17 = vadd.f32 %v1224_v9, %v1220_v15 }
 0x134   : > { %v1207_v18 = vadd.f32 %v1206_v16, %v1205_v53  ;;  %v1226_v19 = vrot.slane %v1225_v17, 4 }
 0x136   : > { %v1208_v62 = vrot.slane %v1207_v18, 2  ;;  %v1227_v20 = vadd.f32 %v1226_v19, %v1225_v17 }
 0x138   : > { %v1209_v21 = vadd.f32 %v1208_v62, %v1207_v18  ;;  %v1228_v22 = vrot.slane %v1227_v20, 2 }
 0x13a   : > { %v1210_v23 = vrot.slane %v1209_v21, 1  ;;  %v1229_v24 = vadd.f32 %v1228_v22, %v1227_v20 }
 0x13c   : > { %v1211_v26 = vadd.f32 %v1210_v23, %v1209_v21  ;;  %v1230_v27 = vrot.slane %v1229_v24, 1 }
 0x13e   : > { %v1212_v30 = vadd.f32 %v1211_v26, %v1200_v25  ;;  %v1231_v31 = vadd.f32 %v1230_v27, %v1229_v24  ;;  %1237 = sbr.rel (%p1729_p5) target bundleno = 363 (0x16b), region = 44 }
 0x140   : > { %1213 = vst [vmem:[#allocation2] sm:$0x1] %v1212_v30  ;;  %v1232_v32 = vadd.f32 %v1231_v31, %v1214_v28 }
 0x142   : > { %1233 = vst [vmem:[#allocation2 + $0x1] sm:$0x1] %v1232_v32 }
 0x143   : > { %v1245_v54 = vld [vmem:[%s2235_s2] sm:$0x1] }
 0x144   : > { %v1259_v52 = vld [vmem:[%s2236_s3] sm:$0x1] }
 0x147   : > { %v1238_v34 = vld [vmem:[#allocation2] sm:$0x1] }
 0x148   : > { %v1239_v36 = vmul.f32 0.0078125, %v1238_v34 }
 0x149   : > { %v1240_v35 = vld [vmem:[#allocation2 + $0x1] sm:$0x1] }
 0x14a   : > { %v1241_v37 = vmul.f32 0.0078125, %v1240_v35  ;;  %v1242_v39 = vmul.f32 %v1239_v36, %v1239_v36 }
 0x14c   : > { %v1243_v40 = vsub.f32 %v1241_v37, %v1242_v39 }
 0x14e   : > { %v1244_v41 = vmax.f32 %v1243_v40, 0.0 }
 0x150   : > { %v1246_v43 = vadd.f32 1e-05, %v1244_v41 }
 0x152   : > { %1857 = vrsqrt.f32 %v1246_v43  ;;  %vm1253_vm0 = vweird.f32 %v1246_v43 }
 0x158   : > { %v1858_v38 = vpop.eup %1857 }
 0x159   : > { %v1248_v45 = vmul.f32 %v1858_v38, %v1246_v43  ;;  %vm1254_vm1 = vweird.f32 %v1858_v38 }
 0x15a   : > { %vm1255_vm2 = vmor %vm1253_vm0, %vm1254_vm1 }
 0x15b   : > { %v1249_v47 = vmul.f32 %v1858_v38, %v1248_v45 }
 0x15d   : > { %v1250_v49 = vmul.f32 0.5, %v1249_v47 }
 0x15f   : > { %v1251_v50 = vsub.f32 1.5, %v1250_v49 }
 0x161   : > { %v1252_v55 = vmul.f32 %v1858_v38, %v1251_v50 }
 0x163   : > { %v1256_v44 = vsel %vm1255_vm2, %v1858_v38, %v1252_v55 }
 0x164   : > { %v1257_v29 = vmul.f32 %v1256_v44, %v1245_v54 }
 0x166   : > { %1258 = vst [vmem:[%s2238_s5] sm:$0x1] %v1257_v29  ;;  %v1260_v57 = vmul.f32 %v1257_v29, %v1239_v36 }
 0x168   : > { %v1261_v59 = vsub.f32 %v1259_v52, %v1260_v57 }
 0x16a   : > { %1262 = vst [vmem:[%s2238_s5 + $0x1] sm:$0x1] %v1261_v59 }
 0x16b PF: > { %s16_s18 = sadd.s32 1, %s1865_s18  }
 0x16c   : > { %p13_p6 = scmp.ge.s32.totalorder %s16_s18, 5  }
 0x16e   :  { %15 = sbr.rel (!%p13_p6) target bundleno = 1 (0x1), region = 82 }

// kernel: conv_block_forward.8
= control target key start
LH: loop header
LB: loop body
LE: loop exit
PB: predicated region body
PF: predicated region fallthrough
CT: control target
= control target key end

     0   :  { %s1193_s21 = smov 0   ;;  %s1345_s0 = inlined_call_operand.vmem [shape: f32[144,128], index: 0, kind: input, shape index: {}]   ;;  %s1346_s1 = inlined_call_operand.vmem [shape: f32[2,128], index: 1, kind: input, shape index: {}]   ;;  %s1347_s2 = inlined_call_operand.vmem [shape: bf16[144,128], index: 2, kind: input, shape index: {}]   ;;  %s1348_s3 = inlined_call_operand.vmem [shape: bf16[128,128], index: 3, kind: input, shape index: {}]   ;;  %s1349_s4 = inlined_call_operand.vmem [shape: f32[1,128], index: 4, kind: input, shape index: {}]   ;;  %s1350_s5 = inlined_call_operand.vmem [shape: f32[1,128], index: 5, kind: input, shape index: {}]   ;;  %s1351_s6 = inlined_call_operand.vmem [shape: bf16[128,128], index: 6, kind: input, shape index: {}]   ;;  %s1352_s7 = inlined_call_operand.vmem [shape: f32[1,128], index: 7, kind: input, shape index: {}]   ;;  %s1353_s8 = inlined_call_operand.vmem [shape: f32[1,128], index: 8, kind: input, shape index: {}]   ;;  %s1354_s9 = inlined_call_operand.vmem [shape: f32[144,128], index: 9, kind: output, shape index: {0}]   ;;  %s1355_s10 = inlined_call_operand.vmem [shape: f32[144,128], index: 10, kind: output, shape index: {1}]   ;;  %s1356_s11 = inlined_call_operand.vmem [shape: f32[2,128], index: 11, kind: output, shape index: {2}]   ;;  %s1357_s12 = inlined_call_operand.vmem [shape: f32[2,128], index: 12, kind: output, shape index: {3}]  }
   0x1 LB: > { %s1199_s22 = sadd.s32 4294967295, %s1125_s21   ;;  %p975_p0 = scmp.ge.s32.totalorder %s1125_s21, 1  ;;  %s1125_s21 = sphi %s1193_s21, %s23_s21  }
   0x2   : > { %p371_p1 = scmp.lt.s32.totalorder %s1125_s21, 4 }
   0x4   : > { %p372_p2 = pnand %p975_p0, %p371_p1 }
   0x5   : > { %s423_s23 = smul.u32 (!%p372_p2), 6, %s1199_s22  ;;  %p980_p4 = scmp.ne.s32.totalorder (!%p372_p2), %s1199_s22, 0 }
   0x6   : > { %375 = sbr.rel (%p372_p2) target bundleno = 267 (0x10b), region = 56 }
   0x7   : > { %p424_p3 = scmp.lt.s32.totalorder (!%p372_p2), %s423_s23, 17 }
   0xb   : > { %s1359_s23 = smov (!%p424_p3, %s423_s23), 17  ;;  %450 = sbr.rel (%p980_p4) target bundleno = 19 (0x13), region = 60 }
   0xc   : > { %s976_s24 = sshll.u32 %s1359_s23, 3  ;;  %s977_s25 = sshll.u32 %s1359_s23, 2 }
   0xd   : > { %s1207_s28 = scalar_lea.vmem %s1345_s0, %s976_s24  ;;  %s1212_s13 = scalar_lea.vmem %s1347_s2, %s977_s25 }
   0xe   : > { %s1217_s16 = scalar_lea.vmem %s1354_s9, %s976_s24  ;;  %s1222_s19 = scalar_lea.vmem %s1355_s10, %s976_s24 }
  0x10   : > { %v1127_v0 = vmov 0.0  }
  0x11   : > { %451 = vst [vmem:[#allocation2] sm:$0x3] %v1127_v0 }
  0x12   : > { %452 = vst [vmem:[#allocation3] sm:$0x3] %v1127_v0 }
  0x13 PF: > { %v1076_v1 = vld [vmem:[%s1348_s3 + $0x38] sm:$0xff]  ;;  %v1075_v3 = vld [vmem:[%s1348_s3 + $0x30] sm:$0xff]  ;;  %v1074_v5 = vld [vmem:[%s1348_s3 + $0x28] sm:$0xff]  ;;  %v482_v8 = vlaneseq  ;;  %s481_s17 = smul.u32 48, %s1199_s22  ;;  %p1066_p5 = scmp.ne.s32.totalorder %s1199_s22, 2 }
  0x14   : > { %v1087_v2 = vld [vmem:[%s1351_s6 + $0x38] sm:$0xff]  ;;  %587 = vmatpush.bf16.msra.mxu0 %v1076_v1  ;;  %1088 = vmatpush.bf16.msra.mxu2 %v1076_v1  ;;  %v1086_v4 = vld [vmem:[%s1351_s6 + $0x30] sm:$0xff]  ;;  %v1085_v6 = vld [vmem:[%s1351_s6 + $0x28] sm:$0xff] }
  0x15   : > { %699 = vmatpush.bf16.msra.mxu1 %v1087_v2  ;;  %1096 = vmatpush.bf16.msra.mxu3 %v1087_v2  ;;  %v1073_v7 = vld [vmem:[%s1348_s3 + $0x20] sm:$0xff]  ;;  %v1072_v10 = vld [vmem:[%s1348_s3 + $0x18] sm:$0xff]  ;;  %v454_v13 = vld [vmem:[%s1207_s28 + $0x8] sm:$0xff]  ;;  %v1259_v14 = vshrl.u32 %v482_v8, 7  ;;  %v489_v26 = vstv %s481_s17 }
  0x16   : > { %v1084_v9 = vld [vmem:[%s1351_s6 + $0x20] sm:$0xff]  ;;  %v455_v15 = vld [vmem:[%s1207_s28 + $0x10] sm:$0xff]  ;;  %v456_v16 = vld [vmem:[%s1207_s28 + $0x18] sm:$0xff] }
  0x17   : > { %v453_v11 = vld [vmem:[%s1207_s28] sm:$0xff]  ;;  %v1083_v17 = vld [vmem:[%s1351_s6 + $0x18] sm:$0xff]  ;;  %v1071_v23 = vld [vmem:[%s1348_s3 + $0x10] sm:$0xff]  ;;  %v484_v24 = vadd.s32 8, %v1259_v14  ;;  %v485_v27 = vadd.s32 16, %v1259_v14  ;;  %v486_v28 = vadd.s32 24, %v1259_v14  ;;  %v490_v34 = vadd.s32 %v489_v26, %v1259_v14 }
  0x18   : > { %588 = vmatpush.bf16.msra.mxu0 %v1075_v3  ;;  %1089 = vmatpush.bf16.msra.mxu2 %v1075_v3  ;;  %v1256_v12 = vld [vmem:[%s1346_s1] ss:$0 sm:$0xff]  ;;  %v1114_v20 = vld [vmem:[%s1346_s1 + $0x1] ss:$0 sm:$0xff]  ;;  %v1082_v25 = vld [vmem:[%s1351_s6 + $0x10] sm:$0xff]  ;;  %v487_v53 = vadd.s32 32, %v1259_v14 }
  0x19   : > { %700 = vmatpush.bf16.msra.mxu1 %v1086_v4  ;;  %1097 = vmatpush.bf16.msra.mxu3 %v1086_v4  ;;  %v461_v18 = vmul.f32 %v1256_v12, %v453_v11  ;;  %v462_v19 = vmul.f32 %v1256_v12, %v454_v13  ;;  %v463_v21 = vmul.f32 %v1256_v12, %v455_v15  ;;  %v1070_v33 = vld [vmem:[%s1348_s3 + $0x8] sm:$0xff]  ;;  %v1069_v43 = vld [vmem:[%s1348_s3] sm:$0xff]  ;;  %vm496_vm0 = vcmp.lt.s32.totalorder %v490_v34, 128  ;;  %v1079_v62 = vld [vmem:[%s1212_s13 + $0x10] sm:$0xff] }
  0x1a   : > { %v464_v22 = vmul.f32 %v1256_v12, %v456_v16  ;;  %v491_v35 = vadd.s32 %v489_v26, %v484_v24  ;;  %v1081_v36 = vld [vmem:[%s1351_s6 + $0x8] sm:$0xff]  ;;  %v492_v37 = vadd.s32 %v489_v26, %v485_v27  ;;  %v493_v38 = vadd.s32 %v489_v26, %v486_v28  ;;  %v1080_v44 = vld [vmem:[%s1351_s6] sm:$0xff] }
  0x1b   : > { %v469_v29 = vadd.f32 %v1114_v20, %v461_v18  ;;  %v470_v30 = vadd.f32 %v1114_v20, %v462_v19  ;;  %v471_v31 = vadd.f32 %v1114_v20, %v463_v21  ;;  %v1077_v47 = vld [vmem:[%s1212_s13] sm:$0xff]  ;;  %v1078_v48 = vld [vmem:[%s1212_s13 + $0x8] sm:$0xff]  ;;  %v488_v54 = vadd.s32 40, %v1259_v14 }
  0x1c   : > { %589 = vmatpush.bf16.msra.mxu0 %v1074_v5  ;;  %1090 = vmatpush.bf16.msra.mxu2 %v1074_v5  ;;  %v472_v32 = vadd.f32 %v1114_v20, %v464_v22  ;;  %vm497_vm1 = vcmp.lt.s32.totalorder %v491_v35, 128  ;;  %vm498_vm2 = vcmp.lt.s32.totalorder %v492_v37, 128  ;;  %vm499_vm3 = vcmp.lt.s32.totalorder %v493_v38, 128  ;;  %v457_v49 = vld [vmem:[%s1207_s28 + $0x20] sm:$0xff]  ;;  %v458_v50 = vld [vmem:[%s1207_s28 + $0x28] sm:$0xff] }
  0x1d   : > { %701 = vmatpush.bf16.msra.mxu1 %v1085_v6  ;;  %1098 = vmatpush.bf16.msra.mxu3 %v1085_v6  ;;  %v475_v39 = vmax.f32 %v469_v29, 0.0  ;;  %v476_v40 = vmax.f32 %v470_v30, 0.0  ;;  %v477_v41 = vmax.f32 %v471_v31, 0.0  ;;  %vm1013_vm4 = vmpackc.low %vm497_vm1, %vm496_vm0  ;;  %v465_v51 = vmul.f32 %v1256_v12, %v457_v49 }
  0x1e   : > { %v478_v42 = vmax.f32 %v472_v32, 0.0  ;;  %vm1016_vm5 = vmpackc.low %vm499_vm3, %vm498_vm2  ;;  %v466_v52 = vmul.f32 %v1256_v12, %v458_v50  ;;  %v494_v57 = vadd.s32 %v489_v26, %v487_v53  ;;  %v495_v58 = vadd.s32 %v489_v26, %v488_v54 }
  0x1f   : > { %v1014_v45 = vpack.c.bf16 %v476_v40, %v475_v39  ;;  %v473_v55 = vadd.f32 %v1114_v20, %v465_v51 }
  0x20   : > { %590 = vmatpush.bf16.msra.mxu0 %v1073_v7  ;;  %1091 = vmatpush.bf16.msra.mxu2 %v1073_v7  ;;  %v1017_v46 = vpack.c.bf16 %v478_v42, %v477_v41  ;;  %v474_v56 = vadd.f32 %v1114_v20, %v466_v52  ;;  %vm500_vm6 = vcmp.lt.s32.totalorder %v494_v57, 128  ;;  %vm501_vm7 = vcmp.lt.s32.totalorder %v495_v58, 128 }
  0x21   : > { %702 = vmatpush.bf16.msra.mxu1 %v1084_v9  ;;  %1099 = vmatpush.bf16.msra.mxu3 %v1084_v9  ;;  %v479_v59 = vmax.f32 %v473_v55, 0.0  ;;  %vm1019_vm8 = vmpackc.low %vm501_vm7, %vm500_vm6 }
  0x22   : > { %v480_v60 = vmax.f32 %v474_v56, 0.0 }
  0x24   : > { %591 = vmatpush.bf16.msra.mxu0 %v1072_v10  ;;  %1092 = vmatpush.bf16.msra.mxu2 %v1072_v10  ;;  %v1020_v61 = vpack.c.bf16 %v480_v60, %v479_v59  ;;  %v735_v59 = vld [vmem:[#allocation2] sm:$0x1] }
  0x25   : > { %703 = vmatpush.bf16.msra.mxu1 %v1083_v17  ;;  %1100 = vmatpush.bf16.msra.mxu3 %v1083_v17 }
  0x28   : > { %592 = vmatpush.bf16.msra.mxu0 %v1071_v23  ;;  %1093 = vmatpush.bf16.msra.mxu2 %v1071_v23 }
  0x29   : > { %704 = vmatpush.bf16.msra.mxu1 %v1082_v25  ;;  %1101 = vmatpush.bf16.msra.mxu3 %v1082_v25 }
  0x2c   : > { %593 = vmatpush.bf16.msra.mxu0 %v1070_v33  ;;  %1094 = vmatpush.bf16.msra.mxu2 %v1070_v33 }
  0x2d   : > { %705 = vmatpush.bf16.msra.mxu1 %v1081_v36  ;;  %1102 = vmatpush.bf16.msra.mxu3 %v1081_v36 }
  0x30   : > { %594 = vmatpush.bf16.msra.mxu0 %v1069_v43  ;;  %1095 = vmatpush.bf16.msra.mxu2 %v1069_v43 }
  0x31   : > { %706 = vmatpush.bf16.msra.mxu1 %v1080_v44  ;;  %1103 = vmatpush.bf16.msra.mxu3 %v1080_v44 }
  0x33   : > { %1015 = vmatmul.msk.bf16.vlgmr.msra.gmra.mxu0 %vm1013_vm4, %v1014_v45  ;;  %1018 = vmatmul.msk.bf16.vlgmr.msra.gmra.mxu2 %vm1016_vm5, %v1017_v46 }
  0x34   : > { %707 = vmatmul.bf16.vlgmr.msra.gmra.mxu1 %v1077_v47  ;;  %712 = vmatmul.bf16.vlgmr.msra.gmra.mxu3 %v1078_v48 }
  0x43   : > { %1021 = vmatmul.msk.bf16.gmra.mxu2 %vm1019_vm8, %v1020_v61 }
  0x44   : > { %717 = vmatmul.bf16.gmra.mxu3 %v1079_v62 }
  0xb0   : > { %v596_v63 = vpop.f32.mrf.mxu0 }
  0xb1   : > { %723 = vst [vmem:[%s1217_s16] sm:$0xff] %v596_v63  ;;  %v708_v0 = vpop.f32.mrf.mxu1  ;;  %v750_v7 = vmul.f32 %v596_v63, %v596_v63 }
  0xb2   : > { %729 = vst [vmem:[%s1222_s19] sm:$0xff] %v708_v0  ;;  %v784_v9 = vmul.f32 %v708_v0, %v708_v0 }
  0xb6   : > { %v601_v1 = vpop.f32.mrf.mxu2 }
  0xb7   : > { %725 = vst [vmem:[%s1217_s16 + $0x10] sm:$0xff] %v601_v1  ;;  %v713_v2 = vpop.f32.mrf.mxu3  ;;  %v752_v17 = vmul.f32 %v601_v1, %v601_v1 }
  0xb8   : > { %731 = vst [vmem:[%s1222_s19 + $0x10] sm:$0xff] %v713_v2  ;;  %v598_v3 = vpop.f32.mrf.mxu0  ;;  %v786_v20 = vmul.f32 %v713_v2, %v713_v2 }
  0xb9   : > { %724 = vst [vmem:[%s1217_s16 + $0x8] sm:$0xff] %v598_v3  ;;  %v710_v4 = vpop.f32.mrf.mxu1  ;;  %v751_v8 = vmul.f32 %v598_v3, %v598_v3  ;;  %v736_v11 = vadd.f32 %v598_v3, %v596_v63 }
  0xba   : > { %730 = vst [vmem:[%s1222_s19 + $0x8] sm:$0xff] %v710_v4  ;;  %v785_v10 = vmul.f32 %v710_v4, %v710_v4  ;;  %v770_v12 = vadd.f32 %v710_v4, %v708_v0  ;;  %v769_v0 = vld [vmem:[#allocation3] sm:$0x1] }
  0xbb   : > { %v756_v14 = vadd.f32 %v751_v8, %v750_v7  ;;  %v737_v18 = vadd.f32 %v736_v11, %v601_v1  ;;  %v749_v1 = vld [vmem:[#allocation2 + $0x1] sm:$0x1] }
  0xbc   : > { %v790_v16 = vadd.f32 %v785_v10, %v784_v9  ;;  %v771_v21 = vadd.f32 %v770_v12, %v713_v2 }
  0xbd   : > { %v757_v23 = vadd.f32 %v756_v14, %v752_v17 }
  0xbe   : > { %v603_v5 = vpop.f32.mrf.mxu2  ;;  %v791_v26 = vadd.f32 %v790_v16, %v786_v20 }
  0xbf   : > { %726 = vst [vmem:[%s1217_s16 + $0x18] sm:$0xff] %v603_v5  ;;  %v715_v6 = vpop.f32.mrf.mxu3  ;;  %v753_v19 = vmul.f32 %v603_v5, %v603_v5  ;;  %v738_v24 = vadd.f32 %v737_v18, %v603_v5 }
  0xc0   : > { %732 = vst [vmem:[%s1222_s19 + $0x18] sm:$0xff] %v715_v6  ;;  %v787_v22 = vmul.f32 %v715_v6, %v715_v6  ;;  %v772_v27 = vadd.f32 %v771_v21, %v715_v6  ;;  %v783_v6 = vld [vmem:[#allocation3 + $0x1] sm:$0x1] }
  0xc1   : > { %v758_v29 = vadd.f32 %v757_v23, %v753_v19 }
  0xc2   : > { %v792_v31 = vadd.f32 %v791_v26, %v787_v22 }
  0xc6   : > { %v606_v13 = vpop.f32.mrf.mxu2 }
  0xc7   : > { %727 = vst [vmem:[%s1217_s16 + $0x20] sm:$0xff] %v606_v13  ;;  %v718_v15 = vpop.f32.mrf.mxu3  ;;  %v754_v25 = vmul.f32 %v606_v13, %v606_v13  ;;  %v739_v30 = vadd.f32 %v738_v24, %v606_v13 }
  0xc8   : > { %733 = vst [vmem:[%s1222_s19 + $0x20] sm:$0xff] %v718_v15  ;;  %v788_v28 = vmul.f32 %v718_v15, %v718_v15  ;;  %v773_v32 = vadd.f32 %v772_v27, %v718_v15 }
  0xc9   : > { %v759_v34 = vadd.f32 %v758_v29, %v754_v25 }
  0xca   : > { %v793_v38 = vadd.f32 %v792_v31, %v788_v28 }
  0xce   : > { %v608_v33 = vpop.f32.mrf.mxu2 }
  0xcf   : > { %728 = vst [vmem:[%s1217_s16 + $0x28] sm:$0xff] %v608_v33  ;;  %v740_v35 = vadd.f32 %v739_v30, %v608_v33  ;;  %v755_v36 = vmul.f32 %v608_v33, %v608_v33  ;;  %v720_v37 = vpop.f32.mrf.mxu3 }
  0xd0   : > { %734 = vst [vmem:[%s1222_s19 + $0x28] sm:$0xff] %v720_v37  ;;  %v774_v39 = vadd.f32 %v773_v32, %v720_v37  ;;  %v789_v40 = vmul.f32 %v720_v37, %v720_v37 }
  0xd1   : > { %v741_v41 = vrot.slane %v740_v35, 4  ;;  %v760_v42 = vadd.f32 %v759_v34, %v755_v36 }
  0xd2   : > { %v775_v43 = vrot.slane %v774_v39, 4  ;;  %v794_v44 = vadd.f32 %v793_v38, %v789_v40 }
  0xd3   : > { %v742_v45 = vadd.f32 %v741_v41, %v740_v35  ;;  %v761_v46 = vrot.slane %v760_v42, 4 }
  0xd4   : > { %v776_v47 = vadd.f32 %v775_v43, %v774_v39  ;;  %v795_v48 = vrot.slane %v794_v44, 4 }
  0xd5   : > { %v743_v49 = vrot.slane %v742_v45, 2  ;;  %v762_v50 = vadd.f32 %v761_v46, %v760_v42 }
  0xd6   : > { %v777_v51 = vrot.slane %v776_v47, 2  ;;  %v796_v52 = vadd.f32 %v795_v48, %v794_v44 }
  0xd7   : > { %v744_v53 = vadd.f32 %v743_v49, %v742_v45  ;;  %v763_v54 = vrot.slane %v762_v50, 2 }
  0xd8   : > { %v778_v55 = vadd.f32 %v777_v51, %v776_v47  ;;  %v797_v56 = vrot.slane %v796_v52, 2 }
  0xd9   : > { %v745_v57 = vrot.slane %v744_v53, 1  ;;  %v764_v58 = vadd.f32 %v763_v54, %v762_v50 }
  0xda   : > { %v779_v60 = vrot.slane %v778_v55, 1  ;;  %v798_v61 = vadd.f32 %v797_v56, %v796_v52 }
  0xdb   : > { %v746_v62 = vadd.f32 %v745_v57, %v744_v53  ;;  %v765_v63 = vrot.slane %v764_v58, 1 }
  0xdc   : > { %v780_v2 = vadd.f32 %v779_v60, %v778_v55  ;;  %v799_v3 = vrot.slane %v798_v61, 1 }
  0xdd   : > { %v747_v4 = vadd.f32 %v746_v62, %v735_v59  ;;  %v766_v5 = vadd.f32 %v765_v63, %v764_v58 }
  0xde   : > { %v781_v7 = vadd.f32 %v780_v2, %v769_v0  ;;  %v800_v8 = vadd.f32 %v799_v3, %v798_v61  ;;  %806 = sbr.rel (%p1066_p5) target bundleno = 267 (0x10b), region = 64 }
  0xdf   : > { %748 = vst [vmem:[#allocation2] sm:$0x1] %v747_v4  ;;  %v767_v9 = vadd.f32 %v766_v5, %v749_v1 }
  0xe0   : > { %782 = vst [vmem:[#allocation3] sm:$0x1] %v781_v7  ;;  %v801_v10 = vadd.f32 %v800_v8, %v783_v6 }
  0xe1   : > { %768 = vst [vmem:[#allocation2 + $0x1] sm:$0x1] %v767_v9 }
  0xe2   : > { %802 = vst [vmem:[#allocation3 + $0x1] sm:$0x1] %v801_v10 }
  0xe3   : > { %v814_v37 = vld [vmem:[%s1349_s4] sm:$0x1] }
  0xe4   : > { %v839_v39 = vld [vmem:[%s1352_s7] sm:$0x1] }
  0xe5   : > { %v828_v44 = vld [vmem:[%s1350_s5] sm:$0x1] }
  0xe6   : > { %v807_v11 = vld [vmem:[#allocation2] sm:$0x1] }
  0xe7   : > { %v808_v13 = vmul.f32 0.0078125, %v807_v11  ;;  %v832_v15 = vld [vmem:[#allocation3] sm:$0x1]  ;;  %v853_v47 = vld [vmem:[%s1353_s8] sm:$0x1] }
  0xe8   : > { %v809_v12 = vld [vmem:[#allocation2 + $0x1] sm:$0x1]  ;;  %v833_v16 = vmul.f32 0.0078125, %v832_v15 }
  0xe9   : > { %v810_v14 = vmul.f32 0.0078125, %v809_v12  ;;  %v834_v17 = vld [vmem:[#allocation3 + $0x1] sm:$0x1]  ;;  %v811_v18 = vmul.f32 %v808_v13, %v808_v13 }
  0xea   : > { %v835_v19 = vmul.f32 0.0078125, %v834_v17  ;;  %v836_v20 = vmul.f32 %v833_v16, %v833_v16 }
  0xeb   : > { %v812_v21 = vsub.f32 %v810_v14, %v811_v18 }
  0xec   : > { %v837_v22 = vsub.f32 %v835_v19, %v836_v20 }
  0xed   : > { %v813_v23 = vmax.f32 %v812_v21, 0.0 }
  0xee   : > { %v838_v24 = vmax.f32 %v837_v22, 0.0 }
  0xef   : > { %v815_v25 = vadd.f32 1e-05, %v813_v23 }
  0xf0   : > { %v840_v26 = vadd.f32 1e-05, %v838_v24 }
  0xf1   : > { %1115 = vrsqrt.f32 %v815_v25  ;;  %vm822_vm9 = vweird.f32 %v815_v25 }
  0xf2   : > { %1117 = vrsqrt.f32 %v840_v26  ;;  %vm847_vm11 = vweird.f32 %v840_v26 }
  0xf7   : > { %v1116_v27 = vpop.eup %1115 }
  0xf8   : > { %v1118_v28 = vpop.eup %1117  ;;  %v817_v29 = vmul.f32 %v1116_v27, %v815_v25  ;;  %vm823_vm10 = vweird.f32 %v1116_v27 }
  0xf9   : > { %v842_v30 = vmul.f32 %v1118_v28, %v840_v26  ;;  %vm848_vm12 = vweird.f32 %v1118_v28  ;;  %vm824_vm13 = vmor %vm822_vm9, %vm823_vm10 }
  0xfa   : > { %v818_v31 = vmul.f32 %v1116_v27, %v817_v29  ;;  %vm849_vm14 = vmor %vm847_vm11, %vm848_vm12 }
  0xfb   : > { %v843_v32 = vmul.f32 %v1118_v28, %v842_v30 }
  0xfc   : > { %v819_v33 = vmul.f32 0.5, %v818_v31 }
  0xfd   : > { %v844_v34 = vmul.f32 0.5, %v843_v32 }
  0xfe   : > { %v820_v35 = vsub.f32 1.5, %v819_v33 }
  0xff   : > { %v845_v36 = vsub.f32 1.5, %v844_v34 }
 0x100   : > { %v821_v38 = vmul.f32 %v1116_v27, %v820_v35 }
 0x101   : > { %v846_v40 = vmul.f32 %v1118_v28, %v845_v36 }
 0x102   : > { %v825_v41 = vsel %vm824_vm13, %v1116_v27, %v821_v38 }
 0x103   : > { %v826_v42 = vmul.f32 %v825_v41, %v814_v37  ;;  %v850_v43 = vsel %vm849_vm14, %v1118_v28, %v846_v40 }
 0x104   : > { %v851_v45 = vmul.f32 %v850_v43, %v839_v39 }
 0x105   : > { %827 = vst [vmem:[%s1356_s11] sm:$0x1] %v826_v42  ;;  %v829_v46 = vmul.f32 %v826_v42, %v808_v13 }
 0x106   : > { %852 = vst [vmem:[%s1357_s12] sm:$0x1] %v851_v45  ;;  %v854_v48 = vmul.f32 %v851_v45, %v833_v16 }
 0x107   : > { %v830_v49 = vsub.f32 %v828_v44, %v829_v46 }
 0x108   : > { %v855_v50 = vsub.f32 %v853_v47, %v854_v48 }
 0x109   : > { %831 = vst [vmem:[%s1356_s11 + $0x1] sm:$0x1] %v830_v49 }
 0x10a   : > { %856 = vst [vmem:[%s1357_s12 + $0x1] sm:$0x1] %v855_v50 }
 0x10b PF: > { %s23_s21 = sadd.s32 1, %s1125_s21  }
 0x10c   : > { %p20_p6 = scmp.ge.s32.totalorder %s23_s21, 5  }
 0x10e   :  { %22 = sbr.rel (!%p20_p6) target bundleno = 1 (0x1), region = 125 }

</bundles_post_ra>
